<compile_context>
chip_gen: v7x
topology: tpu7x:2x2x1
jax: 0.10.0
libtpu: 0.0.40
codegen_flags: <defaults>
</compile_context>

<pallas_src>
import functools

import jax
import jax.numpy as jnp
from jax.experimental import pallas as pl
from jax.experimental.pallas import tpu as pltpu

# Safe scoped-VMEM budget on v5e/v6e/v7x (raises v5e's 16 MiB default).
_VMEM_LIMIT = 32 * 1024 * 1024


# ----------------------------------------------------------------------------
# Encoder GRU kernel: grid over source timesteps, hidden state carried in VMEM.
# ----------------------------------------------------------------------------
def _encoder_gru_kernel(x_ref, wih_ref, whh_ref, bih_ref, bhh_ref,
                        enc_out_ref, h_final_ref, h_state):
    t = pl.program_id(0)

    @pl.when(t == 0)
    def _():
        # encoder.init_hidden(batch) == zeros
        h_state[...] = jnp.zeros_like(h_state)

    H = h_state.shape[-1]
    x = x_ref[0]                                   # (B, E)  bf16
    h = h_state[...]                               # (B, H)  f32
    cdt = x.dtype

    gx = jnp.dot(x, wih_ref[...], preferred_element_type=jnp.float32) + bih_ref[...]
    gh = (jnp.dot(h.astype(cdt), whh_ref[...], preferred_element_type=jnp.float32)
          + bhh_ref[...])

    r = jax.nn.sigmoid(gx[:, :H] + gh[:, :H])
    z = jax.nn.sigmoid(gx[:, H:2 * H] + gh[:, H:2 * H])
    n = jnp.tanh(gx[:, 2 * H:] + r * gh[:, 2 * H:])
    h_new = (1.0 - z) * n + z * h

    h_state[...] = h_new
    enc_out_ref[0] = h_new.astype(enc_out_ref.dtype)

    @pl.when(t == pl.num_programs(0) - 1)
    def _():
        h_final_ref[...] = h_new                   # written once, at the last step


def run_encoder(x_emb, wih_t, whh_t, b_ih, b_hh):
    S, B, E = x_emb.shape
    H = whh_t.shape[0]
    return pl.pallas_call(
        _encoder_gru_kernel,
        out_shape=(jax.ShapeDtypeStruct((S, B, H), x_emb.dtype),   # bf16 enc states
                   jax.ShapeDtypeStruct((B, H), jnp.float32)),     # f32 final hidden
        grid_spec=pltpu.PrefetchScalarGridSpec(
            num_scalar_prefetch=0,
            grid=(S,),
            in_specs=[
                pl.BlockSpec((1, B, E), lambda t: (t, 0, 0)),
                pl.BlockSpec((E, 3 * H), lambda t: (0, 0)),
                pl.BlockSpec((H, 3 * H), lambda t: (0, 0)),
                pl.BlockSpec((1, 3 * H), lambda t: (0, 0)),
                pl.BlockSpec((1, 3 * H), lambda t: (0, 0)),
            ],
            out_specs=(
                pl.BlockSpec((1, B, H), lambda t: (t, 0, 0)),
                pl.BlockSpec((B, H), lambda t: (0, 0)),
            ),
            scratch_shapes=[pltpu.VMEM((B, H), jnp.float32)],
        ),
        compiler_params=pltpu.CompilerParams(
            dimension_semantics=("arbitrary",),
            vmem_limit_bytes=_VMEM_LIMIT),
    )(x_emb, wih_t, whh_t, b_ih, b_hh)


# ----------------------------------------------------------------------------
# Attention-decoder recurrence kernel: grid over decode steps (teacher forcing).
# Emits the fused [h | ctx] activation and the attention weights; the vocab
# projection + log-softmax is done by a separate parallel kernel (hoisted).
# ----------------------------------------------------------------------------
def _attn_decoder_kernel(dec_emb_ref, enc_ref, encw_ref, h0_ref,
                         w_in_ref, whh_ref, bih_ref, bhh_ref,
                         hc_ref, attn_ref,
                         h_state, ctx_state):
    t = pl.program_id(0)
    H = h_state.shape[-1]

    @pl.when(t == 0)
    def _():
        h_state[...] = h0_ref[...]                  # decoder_hidden = encoder_hidden
        ctx_state[...] = jnp.zeros_like(ctx_state)  # decoder_context = zeros

    x = dec_emb_ref[0]                             # (B, E)  bf16 embedded input
    h = h_state[...]                               # (B, H)  f32
    ctx = ctx_state[...]                           # (B, H)  f32
    cdt = x.dtype

    # GRU on concat([embedded, context]) -- single fused (E+H, 3H) matmul.
    xc = jnp.concatenate([x, ctx.astype(cdt)], axis=-1)                 # (B, E+H)
    gx = jnp.dot(xc, w_in_ref[...], preferred_element_type=jnp.float32) + bih_ref[...]
    gh = (jnp.dot(h.astype(cdt), whh_ref[...], preferred_element_type=jnp.float32)
          + bhh_ref[...])

    r = jax.nn.sigmoid(gx[:, :H] + gh[:, :H])
    z = jax.nn.sigmoid(gx[:, H:2 * H] + gh[:, H:2 * H])
    n = jnp.tanh(gx[:, 2 * H:] + r * gh[:, 2 * H:])
    h_new = (1.0 - z) * n + z * h                  # (B, H) f32

    # 'general' attention: score(h, e_s) = h^T W_a e_s. W_a was folded into the
    # encoder states once outside the loop: encw[b,s,:] = W_a @ enc[b,s,:].
    encw = encw_ref[...]                           # (B, S, H) bf16
    scores = jnp.sum(h_new[:, None, :] * encw, axis=-1)                 # (B, S) f32
    m = jnp.max(scores, axis=-1, keepdims=True)
    e = jnp.exp(scores - m)
    attn = e * pl.reciprocal(jnp.sum(e, axis=-1, keepdims=True), approx=True)
    enc = enc_ref[...]                             # (B, S, H) bf16
    new_ctx = jnp.sum(attn[:, :, None] * enc, axis=1)                   # (B, H) f32

    h_state[...] = h_new
    ctx_state[...] = new_ctx
    # Two lane-aligned slice stores (H is a multiple of 128) -- no VMEM concat.
    hc_ref[0, :, :H] = h_new.astype(hc_ref.dtype)
    hc_ref[0, :, H:] = new_ctx.astype(hc_ref.dtype)
    attn_ref[0] = attn


def run_decoder(dec_emb, enc_bsh, enc_w, h0, w_in_t, whh_t, b_ih, b_hh):
    T, B, E = dec_emb.shape
    _, S, H = enc_bsh.shape
    return pl.pallas_call(
        _attn_decoder_kernel,
        out_shape=(jax.ShapeDtypeStruct((T, B, 2 * H), dec_emb.dtype),  # fused [h,ctx]
                   jax.ShapeDtypeStruct((T, B, S), jnp.float32)),       # attention
        grid_spec=pltpu.PrefetchScalarGridSpec(
            num_scalar_prefetch=0,
            grid=(T,),
            in_specs=[
                pl.BlockSpec((1, B, E), lambda t: (t, 0, 0)),
                pl.BlockSpec((B, S, H), lambda t: (0, 0, 0)),
                pl.BlockSpec((B, S, H), lambda t: (0, 0, 0)),
                pl.BlockSpec((B, H), lambda t: (0, 0)),
                pl.BlockSpec((E + H, 3 * H), lambda t: (0, 0)),
                pl.BlockSpec((H, 3 * H), lambda t: (0, 0)),
                pl.BlockSpec((1, 3 * H), lambda t: (0, 0)),
                pl.BlockSpec((1, 3 * H), lambda t: (0, 0)),
            ],
            out_specs=(
                pl.BlockSpec((1, B, 2 * H), lambda t: (t, 0, 0)),
                pl.BlockSpec((1, B, S), lambda t: (t, 0, 0)),
            ),
            scratch_shapes=[pltpu.VMEM((B, H), jnp.float32),
                            pltpu.VMEM((B, H), jnp.float32)],
        ),
        compiler_params=pltpu.CompilerParams(
            dimension_semantics=("arbitrary",),
            vmem_limit_bytes=_VMEM_LIMIT),
    )(dec_emb, enc_bsh, enc_w, h0, w_in_t, whh_t, b_ih, b_hh)


# ----------------------------------------------------------------------------
# Hoisted output projection + log-softmax: parallel grid over (T*B) row tiles,
# single fused (2H, V) weight, lane-dense V output.
# ----------------------------------------------------------------------------
def _proj_logsoftmax_kernel(hc_ref, w_ref, b_ref, logp_ref):
    logits = (jnp.dot(hc_ref[...], w_ref[...], preferred_element_type=jnp.float32)
              + b_ref[...])                        # (TM, V) f32
    m = jnp.max(logits, axis=-1, keepdims=True)
    lse = m + jnp.log(jnp.sum(jnp.exp(logits - m), axis=-1, keepdims=True))
    logp_ref[...] = logits - lse


def _pick_row_tile(n):
    # Prefer >= 2 blocks (so the 'parallel' axis can shard across v7x cores).
    for tm in (256, 128, 64, 32, 16, 8):
        if n % tm == 0 and n // tm >= 2:
            return tm
    return n


def run_projection(hc2d, w_out, b_out):
    N, K = hc2d.shape
    V = w_out.shape[1]
    tm = _pick_row_tile(N)
    return pl.pallas_call(
        _proj_logsoftmax_kernel,
        out_shape=jax.ShapeDtypeStruct((N, V), jnp.float32),
        grid_spec=pltpu.PrefetchScalarGridSpec(
            num_scalar_prefetch=0,
            grid=(N // tm,),
            in_specs=[
                pl.BlockSpec((tm, K), lambda i: (i, 0)),
                pl.BlockSpec((K, V), lambda i: (0, 0)),
                pl.BlockSpec((1, V), lambda i: (0, 0)),
            ],
            out_specs=pl.BlockSpec((tm, V), lambda i: (i, 0)),
        ),
        compiler_params=pltpu.CompilerParams(
            dimension_semantics=("parallel",),
            vmem_limit_bytes=_VMEM_LIMIT),
    )(hc2d, w_out, b_out)


# ----------------------------------------------------------------------------
# Translator: parameter setup + glue (embeddings / layout) around the kernels.
# ----------------------------------------------------------------------------
class TranslatorPallas:
    def __init__(self, vocab_size, embedding_size, hidden_size, n_layers,
                 dropout_p, attn_model, max_length, sos_idx=1,
                 param_dtype=jnp.bfloat16, key=None):
        assert n_layers == 1, "only 1-layer GRUs are implemented"
        assert attn_model == "general"
        assert embedding_size % 128 == 0 and hidden_size % 128 == 0 \
            and vocab_size % 128 == 0, "E/H/V must be multiples of 128 (lane axis)"
        self.V, self.E, self.H = vocab_size, embedding_size, hidden_size
        self.max_length = max_length
        self.sos_idx = sos_idx
        self.cdtype = param_dtype                  # matmul operand dtype (bf16)

        key = jax.random.PRNGKey(0) if key is None else key
        ks = jax.random.split(key, 16)

        def u(k, shape, dt=param_dtype):
            return jax.random.uniform(k, shape, jnp.float32, -0.1, 0.1).astype(dt)

        V, E, H = vocab_size, embedding_size, hidden_size
        # encoder params
        self.enc_emb = u(ks[0], (V, E))
        self.enc_wih_t = u(ks[1], (E, 3 * H))
        self.enc_whh_t = u(ks[2], (H, 3 * H))
        self.enc_bih = u(ks[3], (1, 3 * H), jnp.float32)
        self.enc_bhh = u(ks[4], (1, 3 * H), jnp.float32)
        # decoder params (GRU input = concat(embedding, context) = E + H, fused)
        self.dec_emb_tbl = u(ks[5], (V, E))
        self.dec_w_in = u(ks[6], (E + H, 3 * H))          # fused [W_x ; W_c]
        self.dec_whh_t = u(ks[7], (H, 3 * H))
        self.dec_bih = u(ks[8], (1, 3 * H), jnp.float32)
        self.dec_bhh = u(ks[9], (1, 3 * H), jnp.float32)
        self.w_attn = u(ks[10], (H, H))                   # 'general' attention W_a
        self.w_out = u(ks[11], (2 * H, V))                # fused [W_oh ; W_oc]
        self.b_out = u(ks[12], (1, V), jnp.float32)

    @functools.partial(jax.jit, static_argnums=0)
    def forward(self, input_tokens, target_tokens):
        """Training-mode forward (teacher forcing).

        input_tokens:  (B, S)  int32 source tokens
        target_tokens: (B, T)  int32 target tokens, T == max_length
        returns: decoder log-probs (T, B, V), decoder attentions (T, B, S)
        """
        B0, S = input_tokens.shape
        T = self.max_length

        # Pad batch to a multiple of 8 (sublane alignment); sliced off at the end.
        B = ((B0 + 7) // 8) * 8
        if B != B0:
            pad = B - B0
            input_tokens = jnp.pad(input_tokens, ((0, pad), (0, 0)))
            target_tokens = jnp.pad(target_tokens, ((0, pad), (0, 0)))

        # --- encoder ---
        x_emb = jnp.take(self.enc_emb, input_tokens, axis=0)        # (B, S, E) bf16
        x_emb = jnp.transpose(x_emb, (1, 0, 2))                     # (S, B, E)
        enc_out, h_final = run_encoder(x_emb, self.enc_wih_t, self.enc_whh_t,
                                       self.enc_bih, self.enc_bhh)
        enc_bsh = jnp.transpose(enc_out, (1, 0, 2))                 # (B, S, H) bf16

        # Hoist W_a out of the decode loop: enc_w[b,s,i] = sum_j enc[b,s,j]*W_a[i,j]
        enc_w = jnp.einsum('bsj,ij->bsi', enc_bsh, self.w_attn,
                           preferred_element_type=jnp.float32).astype(self.cdtype)

        # --- decoder inputs: step 0 = SOS, step t = target[:, t-1] ---
        sos = jnp.full((B, 1), self.sos_idx, dtype=target_tokens.dtype)
        dec_tokens = jnp.concatenate([sos, target_tokens[:, :T - 1]], axis=1)
        dec_emb = jnp.take(self.dec_emb_tbl, dec_tokens, axis=0)    # (B, T, E) bf16
        dec_emb = jnp.transpose(dec_emb, (1, 0, 2))                 # (T, B, E)

        # --- recurrent decode (hidden/context only) ---
        hc, attn = run_decoder(dec_emb, enc_bsh, enc_w, h_final,
                               self.dec_w_in, self.dec_whh_t,
                               self.dec_bih, self.dec_bhh)          # (T,B,2H), (T,B,S)

        # --- hoisted vocab projection + log-softmax (parallel, lane-dense V) ---
        logp2d = run_projection(hc.reshape(T * B, 2 * self.H), self.w_out, self.b_out)
        logp = logp2d.reshape(T, B, self.V)

        return logp[:, :B0], attn[:, :B0]


if __name__ == "__main__":
    # Small but hardware-aligned shapes: B multiple of 8 (sublanes); E, H, V
    # multiples of 128 (lanes) so every block / output store is (8,128)-dense.
    vocab_size, embedding_size, hidden_size = 256, 128, 128
    n_layers, dropout_p = 1, 0.1
    B, S, max_length = 8, 8, 8

    model = TranslatorPallas(vocab_size, embedding_size, hidden_size,
                             n_layers, dropout_p, attn_model="general",
                             max_length=max_length, sos_idx=1,
                             key=jax.random.PRNGKey(0))

    key = jax.random.PRNGKey(0)
    k_in, k_tgt = jax.random.split(key)
    input_tokens = jax.random.randint(k_in, (B, S), 0, vocab_size, dtype=jnp.int32)
    target_tokens = jax.random.randint(k_tgt, (B, max_length), 0, vocab_size,
                                       dtype=jnp.int32)

    decoder_outputs, decoder_attentions = model.forward(input_tokens, target_tokens)
    jax.block_until_ready((decoder_outputs, decoder_attentions))

    assert decoder_outputs.shape == (max_length, B, vocab_size)
    assert decoder_attentions.shape == (max_length, B, S)
    assert bool(jnp.all(jnp.isfinite(decoder_outputs)))
    # log-softmax rows must sum to 1 in prob space.
    assert jnp.allclose(jnp.exp(decoder_outputs).sum(-1), 1.0, atol=1e-3)
    # attention rows sum to 1 (normalized with the EUP approx reciprocal).
    assert jnp.allclose(decoder_attentions.sum(-1), 1.0, atol=1e-2)
    print("KERNEL_OK")
</pallas_src>

<mosaic_0001>
module attributes {stable_mosaic.version = 11 : i64} {
  func.func @_encoder_gru_kernel(%arg0: i32, %arg1: memref<1x8x128xbf16, #tpu.memory_space<vmem>>, %arg2: memref<128x384xbf16, #tpu.memory_space<vmem>>, %arg3: memref<128x384xbf16, #tpu.memory_space<vmem>>, %arg4: memref<1x384xf32, #tpu.memory_space<vmem>>, %arg5: memref<1x384xf32, #tpu.memory_space<vmem>>, %arg6: memref<1x8x128xbf16, #tpu.memory_space<vmem>>, %arg7: memref<8x128xf32, #tpu.memory_space<vmem>>, %arg8: memref<8x128xf32, #tpu.memory_space<vmem>>) attributes {dimension_semantics = [#tpu.dimension_semantics<arbitrary>], iteration_bounds = array<i64: 8>, scalar_prefetch = 0 : i64, scratch_operands = 1 : i64, tpu.core_type = #tpu.core_type<tc>, window_params = [{transform_indices = @transform_0, window_bounds = array<i64: 1, 8, 128>}, {pipeline_mode = #tpu.pipeline_mode<synchronous>, transform_indices = @transform_1, window_bounds = array<i64: 128, 384>}, {pipeline_mode = #tpu.pipeline_mode<synchronous>, transform_indices = @transform_2, window_bounds = array<i64: 128, 384>}, {pipeline_mode = #tpu.pipeline_mode<synchronous>, transform_indices = @transform_3, window_bounds = array<i64: 1, 384>}, {pipeline_mode = #tpu.pipeline_mode<synchronous>, transform_indices = @transform_4, window_bounds = array<i64: 1, 384>}, {transform_indices = @transform_5, window_bounds = array<i64: 1, 8, 128>}, {pipeline_mode = #tpu.pipeline_mode<synchronous>, transform_indices = @transform_6, window_bounds = array<i64: 8, 128>}]} {
    %c0_i32 = arith.constant 0 : i32
    %0 = arith.cmpi eq, %arg0, %c0_i32 : i32
    %1 = arith.extui %0 : i1 to i32
    %c0_i32_0 = arith.constant 0 : i32
    %2 = arith.cmpi ne, %1, %c0_i32_0 : i32
    scf.if %2 {
      %cst_23 = arith.constant 0.000000e+00 : f32
      %51 = vector.broadcast %cst_23 : f32 to vector<8x128xf32>
      %c0_24 = arith.constant 0 : index
      %c0_25 = arith.constant 0 : index
      %52 = vector.load %arg8[%c0_24, %c0_25] : memref<8x128xf32, #tpu.memory_space<vmem>>, vector<8x128xf32>
      tpu.vector_store %arg8[%c0_24, %c0_25], %51 {strides = array<i32>} : memref<8x128xf32, #tpu.memory_space<vmem>>, vector<8x128xf32>,
    } else {
    }
    %c0 = arith.constant 0 : index
    %c0_1 = arith.constant 0 : index
    %c0_2 = arith.constant 0 : index
    %3 = vector.load %arg1[%c0, %c0_1, %c0_2] : memref<1x8x128xbf16, #tpu.memory_space<vmem>>, vector<1x8x128xbf16>
    %4 = vector.shape_cast %3 : vector<1x8x128xbf16> to vector<8x128xbf16>
    %c0_3 = arith.constant 0 : index
    %c0_4 = arith.constant 0 : index
    %5 = vector.load %arg8[%c0_3, %c0_4] : memref<8x128xf32, #tpu.memory_space<vmem>>, vector<8x128xf32>
    %c0_5 = arith.constant 0 : index
    %c0_6 = arith.constant 0 : index
    %6 = vector.load %arg2[%c0_5, %c0_6] : memref<128x384xbf16, #tpu.memory_space<vmem>>, vector<128x384xbf16>
    %cst = arith.constant dense<0.000000e+00> : vector<8x384xf32>
    %7 = tpu.matmul %4, %6, %cst {dimension_numbers = #tpu.dot_dimension_numbers<[1], [0], [0], [1], [0, 0, 1, 1], [], []>} : vector<8x128xbf16>, vector<128x384xbf16>, vector<8x384xf32> -> vector<8x384xf32>
    %c0_7 = arith.constant 0 : index
    %c0_8 = arith.constant 0 : index
    %8 = vector.load %arg4[%c0_7, %c0_8] : memref<1x384xf32, #tpu.memory_space<vmem>>, vector<1x384xf32>
    %9 = vector.broadcast %8 : vector<1x384xf32> to vector<8x384xf32>
    %10 = arith.addf %7, %9 : vector<8x384xf32>
    %11 = arith.truncf %5 : vector<8x128xf32> to vector<8x128xbf16>
    %c0_9 = arith.constant 0 : index
    %c0_10 = arith.constant 0 : index
    %12 = vector.load %arg3[%c0_9, %c0_10] : memref<128x384xbf16, #tpu.memory_space<vmem>>, vector<128x384xbf16>
    %cst_11 = arith.constant dense<0.000000e+00> : vector<8x384xf32>
    %13 = tpu.matmul %11, %12, %cst_11 {dimension_numbers = #tpu.dot_dimension_numbers<[1], [0], [0], [1], [0, 0, 1, 1], [], []>} : vector<8x128xbf16>, vector<128x384xbf16>, vector<8x384xf32> -> vector<8x384xf32>
    %c0_12 = arith.constant 0 : index
    %c0_13 = arith.constant 0 : index
    %14 = vector.load %arg5[%c0_12, %c0_13] : memref<1x384xf32, #tpu.memory_space<vmem>>, vector<1x384xf32>
    %15 = vector.broadcast %14 : vector<1x384xf32> to vector<8x384xf32>
    %16 = arith.addf %13, %15 : vector<8x384xf32>
    %17 = vector.extract_strided_slice %10 {offsets = [0, 0], sizes = [8, 128], strides = [1, 1]} : vector<8x384xf32> to vector<8x128xf32>
    %18 = vector.extract_strided_slice %16 {offsets = [0, 0], sizes = [8, 128], strides = [1, 1]} : vector<8x384xf32> to vector<8x128xf32>
    %19 = arith.addf %17, %18 : vector<8x128xf32>
    %20 = arith.negf %19 : vector<8x128xf32>
    %21 = math.exp %20 : vector<8x128xf32>
    %cst_14 = arith.constant 1.000000e+00 : f32
    %22 = vector.broadcast %cst_14 : f32 to vector<8x128xf32>
    %23 = arith.addf %22, %21 : vector<8x128xf32>
    %24 = arith.divf %22, %23 : vector<8x128xf32>
    %25 = vector.extract_strided_slice %10 {offsets = [0, 128], sizes = [8, 128], strides = [1, 1]} : vector<8x384xf32> to vector<8x128xf32>
    %26 = vector.extract_strided_slice %16 {offsets = [0, 128], sizes = [8, 128], strides = [1, 1]} : vector<8x384xf32> to vector<8x128xf32>
    %27 = arith.addf %25, %26 : vector<8x128xf32>
    %28 = arith.negf %27 : vector<8x128xf32>
    %29 = math.exp %28 : vector<8x128xf32>
    %cst_15 = arith.constant 1.000000e+00 : f32
    %30 = vector.broadcast %cst_15 : f32 to vector<8x128xf32>
    %31 = arith.addf %30, %29 : vector<8x128xf32>
    %32 = arith.divf %30, %31 : vector<8x128xf32>
    %33 = vector.extract_strided_slice %10 {offsets = [0, 256], sizes = [8, 128], strides = [1, 1]} : vector<8x384xf32> to vector<8x128xf32>
    %34 = vector.extract_strided_slice %16 {offsets = [0, 256], sizes = [8, 128], strides = [1, 1]} : vector<8x384xf32> to vector<8x128xf32>
    %35 = arith.mulf %24, %34 : vector<8x128xf32>
    %36 = arith.addf %33, %35 : vector<8x128xf32>
    %37 = math.tanh %36 : vector<8x128xf32>
    %cst_16 = arith.constant 1.000000e+00 : f32
    %38 = vector.broadcast %cst_16 : f32 to vector<8x128xf32>
    %39 = arith.subf %38, %32 : vector<8x128xf32>
    %40 = arith.mulf %39, %37 : vector<8x128xf32>
    %41 = arith.mulf %32, %5 : vector<8x128xf32>
    %42 = arith.addf %40, %41 : vector<8x128xf32>
    %c0_17 = arith.constant 0 : index
    %c0_18 = arith.constant 0 : index
    %43 = vector.load %arg8[%c0_17, %c0_18] : memref<8x128xf32, #tpu.memory_space<vmem>>, vector<8x128xf32>
    tpu.vector_store %arg8[%c0_17, %c0_18], %42 {strides = array<i32>} : memref<8x128xf32, #tpu.memory_space<vmem>>, vector<8x128xf32>,
    %44 = arith.truncf %42 : vector<8x128xf32> to vector<8x128xbf16>
    %c0_19 = arith.constant 0 : index
    %c0_20 = arith.constant 0 : index
    %c0_21 = arith.constant 0 : index
    %45 = vector.load %arg6[%c0_19, %c0_20, %c0_21] : memref<1x8x128xbf16, #tpu.memory_space<vmem>>, vector<1x8x128xbf16>
    %46 = vector.shape_cast %45 : vector<1x8x128xbf16> to vector<8x128xbf16>
    %47 = vector.shape_cast %44 : vector<8x128xbf16> to vector<1x8x128xbf16>
    tpu.vector_store %arg6[%c0_19, %c0_20, %c0_21], %47 {strides = array<i32>} : memref<1x8x128xbf16, #tpu.memory_space<vmem>>, vector<1x8x128xbf16>,
    %c7_i32 = arith.constant 7 : i32
    %48 = arith.cmpi eq, %arg0, %c7_i32 : i32
    %49 = arith.extui %48 : i1 to i32
    %c0_i32_22 = arith.constant 0 : i32
    %50 = arith.cmpi ne, %49, %c0_i32_22 : i32
    scf.if %50 {
      %c0_23 = arith.constant 0 : index
      %c0_24 = arith.constant 0 : index
      %51 = vector.load %arg7[%c0_23, %c0_24] : memref<8x128xf32, #tpu.memory_space<vmem>>, vector<8x128xf32>
      tpu.vector_store %arg7[%c0_23, %c0_24], %42 {strides = array<i32>} : memref<8x128xf32, #tpu.memory_space<vmem>>, vector<8x128xf32>,
    } else {
    }
    return
  }
  func.func @transform_0(%arg0: i32) -> (i32, i32, i32) {
    %c0_i32 = arith.constant 0 : i32
    %c0_i32_0 = arith.constant 0 : i32
    %c0_i32_1 = arith.constant 0 : i32
    return %arg0, %c0_i32, %c0_i32_0 : i32, i32, i32
  }
  func.func @transform_1(%arg0: i32) -> (i32, i32) {
    %c0_i32 = arith.constant 0 : i32
    %c0_i32_0 = arith.constant 0 : i32
    %c0_i32_1 = arith.constant 0 : i32
    return %c0_i32, %c0_i32_0 : i32, i32
  }
  func.func @transform_2(%arg0: i32) -> (i32, i32) {
    %c0_i32 = arith.constant 0 : i32
    %c0_i32_0 = arith.constant 0 : i32
    %c0_i32_1 = arith.constant 0 : i32
    return %c0_i32, %c0_i32_0 : i32, i32
  }
  func.func @transform_3(%arg0: i32) -> (i32, i32) {
    %c0_i32 = arith.constant 0 : i32
    %c0_i32_0 = arith.constant 0 : i32
    %c0_i32_1 = arith.constant 0 : i32
    return %c0_i32, %c0_i32_0 : i32, i32
  }
  func.func @transform_4(%arg0: i32) -> (i32, i32) {
    %c0_i32 = arith.constant 0 : i32
    %c0_i32_0 = arith.constant 0 : i32
    %c0_i32_1 = arith.constant 0 : i32
    return %c0_i32, %c0_i32_0 : i32, i32
  }
  func.func @transform_5(%arg0: i32) -> (i32, i32, i32) {
    %c0_i32 = arith.constant 0 : i32
    %c0_i32_0 = arith.constant 0 : i32
    %c0_i32_1 = arith.constant 0 : i32
    return %arg0, %c0_i32, %c0_i32_0 : i32, i32, i32
  }
  func.func @transform_6(%arg0: i32) -> (i32, i32) {
    %c0_i32 = arith.constant 0 : i32
    %c0_i32_0 = arith.constant 0 : i32
    %c0_i32_1 = arith.constant 0 : i32
    return %c0_i32, %c0_i32_0 : i32, i32
  }
}

module attributes {stable_mosaic.version = 11 : i64} {
  func.func @_attn_decoder_kernel(%arg0: i32, %arg1: memref<1x8x128xbf16, #tpu.memory_space<vmem>>, %arg2: memref<8x8x128xbf16, #tpu.memory_space<vmem>>, %arg3: memref<8x8x128xbf16, #tpu.memory_space<vmem>>, %arg4: memref<8x128xf32, #tpu.memory_space<vmem>>, %arg5: memref<256x384xbf16, #tpu.memory_space<vmem>>, %arg6: memref<128x384xbf16, #tpu.memory_space<vmem>>, %arg7: memref<1x384xf32, #tpu.memory_space<vmem>>, %arg8: memref<1x384xf32, #tpu.memory_space<vmem>>, %arg9: memref<1x8x256xbf16, #tpu.memory_space<vmem>>, %arg10: memref<1x8x8xf32, #tpu.memory_space<vmem>>, %arg11: memref<8x128xf32, #tpu.memory_space<vmem>>, %arg12: memref<8x128xf32, #tpu.memory_space<vmem>>) attributes {dimension_semantics = [#tpu.dimension_semantics<arbitrary>], iteration_bounds = array<i64: 8>, scalar_prefetch = 0 : i64, scratch_operands = 2 : i64, tpu.core_type = #tpu.core_type<tc>, window_params = [{transform_indices = @transform_0, window_bounds = array<i64: 1, 8, 128>}, {pipeline_mode = #tpu.pipeline_mode<synchronous>, transform_indices = @transform_1, window_bounds = array<i64: 8, 8, 128>}, {pipeline_mode = #tpu.pipeline_mode<synchronous>, transform_indices = @transform_2, window_bounds = array<i64: 8, 8, 128>}, {pipeline_mode = #tpu.pipeline_mode<synchronous>, transform_indices = @transform_3, window_bounds = array<i64: 8, 128>}, {pipeline_mode = #tpu.pipeline_mode<synchronous>, transform_indices = @transform_4, window_bounds = array<i64: 256, 384>}, {pipeline_mode = #tpu.pipeline_mode<synchronous>, transform_indices = @transform_5, window_bounds = array<i64: 128, 384>}, {pipeline_mode = #tpu.pipeline_mode<synchronous>, transform_indices = @transform_6, window_bounds = array<i64: 1, 384>}, {pipeline_mode = #tpu.pipeline_mode<synchronous>, transform_indices = @transform_7, window_bounds = array<i64: 1, 384>}, {transform_indices = @transform_8, window_bounds = array<i64: 1, 8, 256>}, {transform_indices = @transform_9, window_bounds = array<i64: 1, 8, 8>}]} {
    %c0_i32 = arith.constant 0 : i32
    %0 = arith.cmpi eq, %arg0, %c0_i32 : i32
    %1 = arith.extui %0 : i1 to i32
    %c0_i32_0 = arith.constant 0 : i32
    %2 = arith.cmpi ne, %1, %c0_i32_0 : i32
    scf.if %2 {
      %c0_41 = arith.constant 0 : index
      %c0_42 = arith.constant 0 : index
      %81 = vector.load %arg4[%c0_41, %c0_42] : memref<8x128xf32, #tpu.memory_space<vmem>>, vector<8x128xf32>
      %c0_43 = arith.constant 0 : index
      %c0_44 = arith.constant 0 : index
      %82 = vector.load %arg11[%c0_43, %c0_44] : memref<8x128xf32, #tpu.memory_space<vmem>>, vector<8x128xf32>
      tpu.vector_store %arg11[%c0_43, %c0_44], %81 {strides = array<i32>} : memref<8x128xf32, #tpu.memory_space<vmem>>, vector<8x128xf32>,
      %cst_45 = arith.constant 0.000000e+00 : f32
      %83 = vector.broadcast %cst_45 : f32 to vector<8x128xf32>
      %c0_46 = arith.constant 0 : index
      %c0_47 = arith.constant 0 : index
      %84 = vector.load %arg12[%c0_46, %c0_47] : memref<8x128xf32, #tpu.memory_space<vmem>>, vector<8x128xf32>
      tpu.vector_store %arg12[%c0_46, %c0_47], %83 {strides = array<i32>} : memref<8x128xf32, #tpu.memory_space<vmem>>, vector<8x128xf32>,
    } else {
    }
    %c0 = arith.constant 0 : index
    %c0_1 = arith.constant 0 : index
    %c0_2 = arith.constant 0 : index
    %3 = vector.load %arg1[%c0, %c0_1, %c0_2] : memref<1x8x128xbf16, #tpu.memory_space<vmem>>, vector<1x8x128xbf16>
    %4 = vector.shape_cast %3 : vector<1x8x128xbf16> to vector<8x128xbf16>
    %c0_3 = arith.constant 0 : index
    %c0_4 = arith.constant 0 : index
    %5 = vector.load %arg11[%c0_3, %c0_4] : memref<8x128xf32, #tpu.memory_space<vmem>>, vector<8x128xf32>
    %c0_5 = arith.constant 0 : index
    %c0_6 = arith.constant 0 : index
    %6 = vector.load %arg12[%c0_5, %c0_6] : memref<8x128xf32, #tpu.memory_space<vmem>>, vector<8x128xf32>
    %7 = arith.truncf %6 : vector<8x128xf32> to vector<8x128xbf16>
    %8 = tpu.concatenate %4, %7 in 1 : vector<8x128xbf16>, vector<8x128xbf16> -> vector<8x256xbf16>
    %c0_7 = arith.constant 0 : index
    %c0_8 = arith.constant 0 : index
    %9 = vector.load %arg5[%c0_7, %c0_8] : memref<256x384xbf16, #tpu.memory_space<vmem>>, vector<256x384xbf16>
    %cst = arith.constant dense<0.000000e+00> : vector<8x384xf32>
    %10 = tpu.matmul %8, %9, %cst {dimension_numbers = #tpu.dot_dimension_numbers<[1], [0], [0], [1], [0, 0, 1, 1], [], []>} : vector<8x256xbf16>, vector<256x384xbf16>, vector<8x384xf32> -> vector<8x384xf32>
    %c0_9 = arith.constant 0 : index
    %c0_10 = arith.constant 0 : index
    %11 = vector.load %arg7[%c0_9, %c0_10] : memref<1x384xf32, #tpu.memory_space<vmem>>, vector<1x384xf32>
    %12 = vector.broadcast %11 : vector<1x384xf32> to vector<8x384xf32>
    %13 = arith.addf %10, %12 : vector<8x384xf32>
    %14 = arith.truncf %5 : vector<8x128xf32> to vector<8x128xbf16>
    %c0_11 = arith.constant 0 : index
    %c0_12 = arith.constant 0 : index
    %15 = vector.load %arg6[%c0_11, %c0_12] : memref<128x384xbf16, #tpu.memory_space<vmem>>, vector<128x384xbf16>
    %cst_13 = arith.constant dense<0.000000e+00> : vector<8x384xf32>
    %16 = tpu.matmul %14, %15, %cst_13 {dimension_numbers = #tpu.dot_dimension_numbers<[1], [0], [0], [1], [0, 0, 1, 1], [], []>} : vector<8x128xbf16>, vector<128x384xbf16>, vector<8x384xf32> -> vector<8x384xf32>
    %c0_14 = arith.constant 0 : index
    %c0_15 = arith.constant 0 : index
    %17 = vector.load %arg8[%c0_14, %c0_15] : memref<1x384xf32, #tpu.memory_space<vmem>>, vector<1x384xf32>
    %18 = vector.broadcast %17 : vector<1x384xf32> to vector<8x384xf32>
    %19 = arith.addf %16, %18 : vector<8x384xf32>
    %20 = vector.extract_strided_slice %13 {offsets = [0, 0], sizes = [8, 128], strides = [1, 1]} : vector<8x384xf32> to vector<8x128xf32>
    %21 = vector.extract_strided_slice %19 {offsets = [0, 0], sizes = [8, 128], strides = [1, 1]} : vector<8x384xf32> to vector<8x128xf32>
    %22 = arith.addf %20, %21 : vector<8x128xf32>
    %23 = arith.negf %22 : vector<8x128xf32>
    %24 = math.exp %23 : vector<8x128xf32>
    %cst_16 = arith.constant 1.000000e+00 : f32
    %25 = vector.broadcast %cst_16 : f32 to vector<8x128xf32>
    %26 = arith.addf %25, %24 : vector<8x128xf32>
    %27 = arith.divf %25, %26 : vector<8x128xf32>
    %28 = vector.extract_strided_slice %13 {offsets = [0, 128], sizes = [8, 128], strides = [1, 1]} : vector<8x384xf32> to vector<8x128xf32>
    %29 = vector.extract_strided_slice %19 {offsets = [0, 128], sizes = [8, 128], strides = [1, 1]} : vector<8x384xf32> to vector<8x128xf32>
    %30 = arith.addf %28, %29 : vector<8x128xf32>
    %31 = arith.negf %30 : vector<8x128xf32>
    %32 = math.exp %31 : vector<8x128xf32>
    %cst_17 = arith.constant 1.000000e+00 : f32
    %33 = vector.broadcast %cst_17 : f32 to vector<8x128xf32>
    %34 = arith.addf %33, %32 : vector<8x128xf32>
    %35 = arith.divf %33, %34 : vector<8x128xf32>
    %36 = vector.extract_strided_slice %13 {offsets = [0, 256], sizes = [8, 128], strides = [1, 1]} : vector<8x384xf32> to vector<8x128xf32>
    %37 = vector.extract_strided_slice %19 {offsets = [0, 256], sizes = [8, 128], strides = [1, 1]} : vector<8x384xf32> to vector<8x128xf32>
    %38 = arith.mulf %27, %37 : vector<8x128xf32>
    %39 = arith.addf %36, %38 : vector<8x128xf32>
    %40 = math.tanh %39 : vector<8x128xf32>
    %cst_18 = arith.constant 1.000000e+00 : f32
    %41 = vector.broadcast %cst_18 : f32 to vector<8x128xf32>
    %42 = arith.subf %41, %35 : vector<8x128xf32>
    %43 = arith.mulf %42, %40 : vector<8x128xf32>
    %44 = arith.mulf %35, %5 : vector<8x128xf32>
    %45 = arith.addf %43, %44 : vector<8x128xf32>
    %c0_19 = arith.constant 0 : index
    %c0_20 = arith.constant 0 : index
    %c0_21 = arith.constant 0 : index
    %46 = vector.load %arg3[%c0_19, %c0_20, %c0_21] : memref<8x8x128xbf16, #tpu.memory_space<vmem>>, vector<8x8x128xbf16>
    %47 = vector.shape_cast %45 : vector<8x128xf32> to vector<8x1x128xf32>
    %48 = arith.extf %46 : vector<8x8x128xbf16> to vector<8x8x128xf32>
    %49 = vector.broadcast %47 : vector<8x1x128xf32> to vector<8x8x128xf32>
    %50 = arith.mulf %49, %48 : vector<8x8x128xf32>
    %cst_22 = arith.constant dense<0.000000e+00> : vector<8x8xf32>
    %51 = vector.multi_reduction <add>, %50, %cst_22 [2] : vector<8x8x128xf32> to vector<8x8xf32>
    %cst_23 = arith.constant dense<0xFF800000> : vector<8xf32>
    %52 = vector.multi_reduction <maximumf>, %51, %cst_23 [1] : vector<8x8xf32> to vector<8xf32>
    %53 = vector.shape_cast %52 : vector<8xf32> to vector<8x1xf32>
    %54 = vector.broadcast %53 : vector<8x1xf32> to vector<8x8xf32>
    %55 = arith.subf %51, %54 : vector<8x8xf32>
    %56 = math.exp %55 : vector<8x8xf32>
    %cst_24 = arith.constant dense<0.000000e+00> : vector<8xf32>
    %57 = vector.multi_reduction <add>, %56, %cst_24 [1] : vector<8x8xf32> to vector<8xf32>
    %58 = vector.shape_cast %57 : vector<8xf32> to vector<8x1xf32>
    %59 = tpu.reciprocal %58 {approx = true} : vector<8x1xf32> -> vector<8x1xf32>
    %60 = vector.broadcast %59 : vector<8x1xf32> to vector<8x8xf32>
    %61 = arith.mulf %56, %60 : vector<8x8xf32>
    %c0_25 = arith.constant 0 : index
    %c0_26 = arith.constant 0 : index
    %c0_27 = arith.constant 0 : index
    %62 = vector.load %arg2[%c0_25, %c0_26, %c0_27] : memref<8x8x128xbf16, #tpu.memory_space<vmem>>, vector<8x8x128xbf16>
    %63 = vector.shape_cast %61 : vector<8x8xf32> to vector<8x8x1xf32>
    %64 = arith.extf %62 : vector<8x8x128xbf16> to vector<8x8x128xf32>
    %65 = vector.broadcast %63 : vector<8x8x1xf32> to vector<8x8x128xf32>
    %66 = arith.mulf %65, %64 : vector<8x8x128xf32>
    %cst_28 = arith.constant dense<0.000000e+00> : vector<8x128xf32>
    %67 = vector.multi_reduction <add>, %66, %cst_28 [1] : vector<8x8x128xf32> to vector<8x128xf32>
    %c0_29 = arith.constant 0 : index
    %c0_30 = arith.constant 0 : index
    %68 = vector.load %arg11[%c0_29, %c0_30] : memref<8x128xf32, #tpu.memory_space<vmem>>, vector<8x128xf32>
    tpu.vector_store %arg11[%c0_29, %c0_30], %45 {strides = array<i32>} : memref<8x128xf32, #tpu.memory_space<vmem>>, vector<8x128xf32>,
    %c0_31 = arith.constant 0 : index
    %c0_32 = arith.constant 0 : index
    %69 = vector.load %arg12[%c0_31, %c0_32] : memref<8x128xf32, #tpu.memory_space<vmem>>, vector<8x128xf32>
    tpu.vector_store %arg12[%c0_31, %c0_32], %67 {strides = array<i32>} : memref<8x128xf32, #tpu.memory_space<vmem>>, vector<8x128xf32>,
    %70 = arith.truncf %45 : vector<8x128xf32> to vector<8x128xbf16>
    %c0_33 = arith.constant 0 : index
    %c0_34 = arith.constant 0 : index
    %c0_35 = arith.constant 0 : index
    %71 = vector.load %arg9[%c0_33, %c0_34, %c0_35] : memref<1x8x256xbf16, #tpu.memory_space<vmem>>, vector<1x8x128xbf16>
    %72 = vector.shape_cast %71 : vector<1x8x128xbf16> to vector<8x128xbf16>
    %73 = vector.shape_cast %70 : vector<8x128xbf16> to vector<1x8x128xbf16>
    tpu.vector_store %arg9[%c0_33, %c0_34, %c0_35], %73 {strides = array<i32>} : memref<1x8x256xbf16, #tpu.memory_space<vmem>>, vector<1x8x128xbf16>,
    %74 = arith.truncf %67 : vector<8x128xf32> to vector<8x128xbf16>
    %c0_36 = arith.constant 0 : index
    %c0_37 = arith.constant 0 : index
    %c128 = arith.constant 128 : index
    %75 = vector.load %arg9[%c0_36, %c0_37, %c128] : memref<1x8x256xbf16, #tpu.memory_space<vmem>>, vector<1x8x128xbf16>
    %76 = vector.shape_cast %75 : vector<1x8x128xbf16> to vector<8x128xbf16>
    %77 = vector.shape_cast %74 : vector<8x128xbf16> to vector<1x8x128xbf16>
    tpu.vector_store %arg9[%c0_36, %c0_37, %c128], %77 {strides = array<i32>} : memref<1x8x256xbf16, #tpu.memory_space<vmem>>, vector<1x8x128xbf16>,
    %c0_38 = arith.constant 0 : index
    %c0_39 = arith.constant 0 : index
    %c0_40 = arith.constant 0 : index
    %78 = vector.load %arg10[%c0_38, %c0_39, %c0_40] : memref<1x8x8xf32, #tpu.memory_space<vmem>>, vector<1x8x8xf32>
    %79 = vector.shape_cast %78 : vector<1x8x8xf32> to vector<8x8xf32>
    %80 = vector.shape_cast %61 : vector<8x8xf32> to vector<1x8x8xf32>
    tpu.vector_store %arg10[%c0_38, %c0_39, %c0_40], %80 {strides = array<i32>} : memref<1x8x8xf32, #tpu.memory_space<vmem>>, vector<1x8x8xf32>,
    return
  }
  func.func @transform_0(%arg0: i32) -> (i32, i32, i32) {
    %c0_i32 = arith.constant 0 : i32
    %c0_i32_0 = arith.constant 0 : i32
    %c0_i32_1 = arith.constant 0 : i32
    return %arg0, %c0_i32, %c0_i32_0 : i32, i32, i32
  }
  func.func @transform_1(%arg0: i32) -> (i32, i32, i32) {
    %c0_i32 = arith.constant 0 : i32
    %c0_i32_0 = arith.constant 0 : i32
    %c0_i32_1 = arith.constant 0 : i32
    %c0_i32_2 = arith.constant 0 : i32
    return %c0_i32, %c0_i32_0, %c0_i32_1 : i32, i32, i32
  }
  func.func @transform_2(%arg0: i32) -> (i32, i32, i32) {
    %c0_i32 = arith.constant 0 : i32
    %c0_i32_0 = arith.constant 0 : i32
    %c0_i32_1 = arith.constant 0 : i32
    %c0_i32_2 = arith.constant 0 : i32
    return %c0_i32, %c0_i32_0, %c0_i32_1 : i32, i32, i32
  }
  func.func @transform_3(%arg0: i32) -> (i32, i32) {
    %c0_i32 = arith.constant 0 : i32
    %c0_i32_0 = arith.constant 0 : i32
    %c0_i32_1 = arith.constant 0 : i32
    return %c0_i32, %c0_i32_0 : i32, i32
  }
  func.func @transform_4(%arg0: i32) -> (i32, i32) {
    %c0_i32 = arith.constant 0 : i32
    %c0_i32_0 = arith.constant 0 : i32
    %c0_i32_1 = arith.constant 0 : i32
    return %c0_i32, %c0_i32_0 : i32, i32
  }
  func.func @transform_5(%arg0: i32) -> (i32, i32) {
    %c0_i32 = arith.constant 0 : i32
    %c0_i32_0 = arith.constant 0 : i32
    %c0_i32_1 = arith.constant 0 : i32
    return %c0_i32, %c0_i32_0 : i32, i32
  }
  func.func @transform_6(%arg0: i32) -> (i32, i32) {
    %c0_i32 = arith.constant 0 : i32
    %c0_i32_0 = arith.constant 0 : i32
    %c0_i32_1 = arith.constant 0 : i32
    return %c0_i32, %c0_i32_0 : i32, i32
  }
  func.func @transform_7(%arg0: i32) -> (i32, i32) {
    %c0_i32 = arith.constant 0 : i32
    %c0_i32_0 = arith.constant 0 : i32
    %c0_i32_1 = arith.constant 0 : i32
    return %c0_i32, %c0_i32_0 : i32, i32
  }
  func.func @transform_8(%arg0: i32) -> (i32, i32, i32) {
    %c0_i32 = arith.constant 0 : i32
    %c0_i32_0 = arith.constant 0 : i32
    %c0_i32_1 = arith.constant 0 : i32
    return %arg0, %c0_i32, %c0_i32_0 : i32, i32, i32
  }
  func.func @transform_9(%arg0: i32) -> (i32, i32, i32) {
    %c0_i32 = arith.constant 0 : i32
    %c0_i32_0 = arith.constant 0 : i32
    %c0_i32_1 = arith.constant 0 : i32
    return %arg0, %c0_i32, %c0_i32_0 : i32, i32, i32
  }
}

module attributes {stable_mosaic.version = 11 : i64} {
  func.func @_proj_logsoftmax_kernel(%arg0: i32, %arg1: memref<32x256xbf16, #tpu.memory_space<vmem>>, %arg2: memref<256x256xbf16, #tpu.memory_space<vmem>>, %arg3: memref<1x256xf32, #tpu.memory_space<vmem>>, %arg4: memref<32x256xf32, #tpu.memory_space<vmem>>) attributes {dimension_semantics = [#tpu.dimension_semantics<parallel>], iteration_bounds = array<i64: 2>, scalar_prefetch = 0 : i64, scratch_operands = 0 : i64, tpu.core_type = #tpu.core_type<tc>, window_params = [{transform_indices = @transform_0, window_bounds = array<i64: 32, 256>}, {pipeline_mode = #tpu.pipeline_mode<synchronous>, transform_indices = @transform_1, window_bounds = array<i64: 256, 256>}, {pipeline_mode = #tpu.pipeline_mode<synchronous>, transform_indices = @transform_2, window_bounds = array<i64: 1, 256>}, {transform_indices = @transform_3, window_bounds = array<i64: 32, 256>}]} {
    %c0 = arith.constant 0 : index
    %c0_0 = arith.constant 0 : index
    %0 = vector.load %arg1[%c0, %c0_0] : memref<32x256xbf16, #tpu.memory_space<vmem>>, vector<32x256xbf16>
    %c0_1 = arith.constant 0 : index
    %c0_2 = arith.constant 0 : index
    %1 = vector.load %arg2[%c0_1, %c0_2] : memref<256x256xbf16, #tpu.memory_space<vmem>>, vector<256x256xbf16>
    %cst = arith.constant dense<0.000000e+00> : vector<32x256xf32>
    %2 = tpu.matmul %0, %1, %cst {dimension_numbers = #tpu.dot_dimension_numbers<[1], [0], [0], [1], [0, 0, 1, 1], [], []>} : vector<32x256xbf16>, vector<256x256xbf16>, vector<32x256xf32> -> vector<32x256xf32>
    %c0_3 = arith.constant 0 : index
    %c0_4 = arith.constant 0 : index
    %3 = vector.load %arg3[%c0_3, %c0_4] : memref<1x256xf32, #tpu.memory_space<vmem>>, vector<1x256xf32>
    %4 = vector.broadcast %3 : vector<1x256xf32> to vector<32x256xf32>
    %5 = arith.addf %2, %4 : vector<32x256xf32>
    %cst_5 = arith.constant dense<0xFF800000> : vector<32xf32>
    %6 = vector.multi_reduction <maximumf>, %5, %cst_5 [1] : vector<32x256xf32> to vector<32xf32>
    %7 = vector.shape_cast %6 : vector<32xf32> to vector<32x1xf32>
    %8 = vector.broadcast %7 : vector<32x1xf32> to vector<32x256xf32>
    %9 = arith.subf %5, %8 : vector<32x256xf32>
    %10 = math.exp %9 : vector<32x256xf32>
    %cst_6 = arith.constant dense<0.000000e+00> : vector<32xf32>
    %11 = vector.multi_reduction <add>, %10, %cst_6 [1] : vector<32x256xf32> to vector<32xf32>
    %12 = vector.shape_cast %11 : vector<32xf32> to vector<32x1xf32>
    %13 = math.log %12 : vector<32x1xf32>
    %14 = arith.addf %7, %13 : vector<32x1xf32>
    %15 = vector.broadcast %14 : vector<32x1xf32> to vector<32x256xf32>
    %16 = arith.subf %5, %15 : vector<32x256xf32>
    %c0_7 = arith.constant 0 : index
    %c0_8 = arith.constant 0 : index
    %17 = vector.load %arg4[%c0_7, %c0_8] : memref<32x256xf32, #tpu.memory_space<vmem>>, vector<32x256xf32>
    tpu.vector_store %arg4[%c0_7, %c0_8], %16 {strides = array<i32>} : memref<32x256xf32, #tpu.memory_space<vmem>>, vector<32x256xf32>,
    return
  }
  func.func @transform_0(%arg0: i32) -> (i32, i32) {
    %c0_i32 = arith.constant 0 : i32
    %c0_i32_0 = arith.constant 0 : i32
    return %arg0, %c0_i32 : i32, i32
  }
  func.func @transform_1(%arg0: i32) -> (i32, i32) {
    %c0_i32 = arith.constant 0 : i32
    %c0_i32_0 = arith.constant 0 : i32
    %c0_i32_1 = arith.constant 0 : i32
    return %c0_i32, %c0_i32_0 : i32, i32
  }
  func.func @transform_2(%arg0: i32) -> (i32, i32) {
    %c0_i32 = arith.constant 0 : i32
    %c0_i32_0 = arith.constant 0 : i32
    %c0_i32_1 = arith.constant 0 : i32
    return %c0_i32, %c0_i32_0 : i32, i32
  }
  func.func @transform_3(%arg0: i32) -> (i32, i32) {
    %c0_i32 = arith.constant 0 : i32
    %c0_i32_0 = arith.constant 0 : i32
    return %arg0, %c0_i32 : i32, i32
  }
}

</mosaic_0001>

<bundles_post_ra>
// kernel: forward.5
= control target key start
LH: loop header
LB: loop body
LE: loop exit
PB: predicated region body
PF: predicated region fallthrough
CT: control target
= control target key end

     0   :  { %8 = vsyncpa [#allocation3], 0  ;;  %s1161_s0 = inlined_call_operand.vmem [shape: bf16[64,256], index: 0, kind: input, shape index: {}]   ;;  %s1162_s1 = inlined_call_operand.vmem [shape: bf16[256,256], index: 1, kind: input, shape index: {}]   ;;  %s1163_s2 = inlined_call_operand.vmem [shape: f32[1,256], index: 2, kind: input, shape index: {}]   ;;  %s1164_s3 = inlined_call_operand.hbm [shape: f32[64,256], index: 3, kind: output, shape index: {}]  }
   0x1   :  { %10 = vsyncpa [#allocation3 + $0x1], 0  ;;  %s900_s12 = smov 0   ;;  %s902_s13 = smov 0  }
   0x2   :  { %s904_s14 = smov 0   ;;  %s906_s15 = smov 0  }
   0x3 LB: > { %s921_s16 = sadd.s32 4294967295, %s875_s15   ;;  %s609_s17 = sadd.s32 4294967294, %s875_s15   ;;  %s875_s15 = sphi %s906_s15, %s1170_s15   ;;  %s871_s14 = sphi %s904_s14, %s1169_s14   ;;  %s867_s13 = sphi %s902_s13, %s1168_s13   ;;  %s863_s12 = sphi %s900_s12, %s1167_s12  }
   0x4   : > { %s925_s18 = sadd.s32 1, %s875_s15   ;;  %s91_s19 = sadd.s32 1, %s871_s14 }
   0x5   : > { %s88_s20 = ssub.s32 %s875_s15, %s925_s18  ;;  %p101_p0 = scmp.ne.s32.totalorder %s871_s14, %s867_s13 }
   0x6   : > { %p89_p1 = scmp.eq.s32.totalorder %s88_s20, 0  ;;  %p102_p2 = scmp.eq.s32.totalorder %s921_s16, 1 }
   0x7   : > { %p107_p3 = scmp.ne.s32.totalorder %s867_s13, %s863_s12  ;;  %p108_p4 = scmp.eq.s32.totalorder %s609_s17, 1 }
   0x8   : > { %s936_s21 = scalar_select %p89_p1, %s871_s14, %s91_s19  }
   0x9   : > { %p938_p5 = por %p102_p2, %p101_p0  ;;  %p942_p6 = por %p108_p4, %p107_p3 }
   0xa   : > { %p612_p7 = scmp.ge.s32.totalorder %s875_s15, 1  ;;  %p142_p8 = scmp.lt.s32.totalorder %s875_s15, 3 }
   0xc   : > { %p143_p9 = pnand %p612_p7, %p142_p8 }
   0xd   : > { %v735_v0 = vld [vmem:[%s1162_s1 + $0x4] ss:$8 sps:$4 sm:$0xff] (!%p143_p9)   ;;  %v737_v1 = vld [vmem:[%s1162_s1] ss:$8 sps:$4 sm:$0xff] (!%p143_p9)   ;;  %v738_v2 = vld [vmem:[%s1162_s1 + $0x14] ss:$8 sps:$4 sm:$0xff] (!%p143_p9)   ;;  %v213_v36 = vlaneseq (!%p143_p9) }
   0xe   : > { %146 = sbr.rel (%p143_p9) target bundleno = 638 (0x27e), region = 32  ;;  %403 = vmatprep.subr.bf16.mxu0 (!%p143_p9), %v735_v0  ;;  %662 = vmatprep.subr.bf16.mxu1 (!%p143_p9), %v735_v0  ;;  %v740_v3 = vld [vmem:[%s1162_s1 + $0x10] ss:$8 sps:$4 sm:$0xff] (!%p143_p9)   ;;  %v741_v4 = vld [vmem:[%s1162_s1 + $0x24] ss:$8 sps:$4 sm:$0xff] (!%p143_p9)   ;;  %s614_s7 = sshll.u32 (!%p143_p9), %s921_s16, 2 }
   0xf   : > { %404 = vmatpush1.bf16.msra.mxu0 (!%p143_p9), %v737_v1  ;;  %678 = vmatpush1.bf16.msra.mxu1 (!%p143_p9), %v737_v1  ;;  %v743_v5 = vld [vmem:[%s1162_s1 + $0x20] ss:$8 sps:$4 sm:$0xff] (!%p143_p9)   ;;  %v744_v6 = vld [vmem:[%s1162_s1 + $0x34] ss:$8 sps:$4 sm:$0xff] (!%p143_p9)   ;;  %p168_p10 = scmp.lt.s32.totalorder (!%p143_p9), %s614_s7, 7  ;;  %v214_v37 = vshrl.u32 (!%p143_p9), %v213_v36, 7 }
  0x10   : > { %405 = vmatprep.subr.bf16.mxu0 (!%p143_p9), %v738_v2  ;;  %663 = vmatprep.subr.bf16.mxu1 (!%p143_p9), %v738_v2  ;;  %v746_v7 = vld [vmem:[%s1162_s1 + $0x30] ss:$8 sps:$4 sm:$0xff] (!%p143_p9)   ;;  %v747_v8 = vld [vmem:[%s1162_s1 + $0x44] ss:$8 sps:$4 sm:$0xff] (!%p143_p9)   ;;  %v749_v9 = vld [vmem:[%s1162_s1 + $0x40] ss:$8 sps:$4 sm:$0xff] (!%p143_p9)  }
  0x11   : > { %v750_v10 = vld [vmem:[%s1162_s1 + $0x54] ss:$8 sps:$4 sm:$0xff] (!%p143_p9)   ;;  %v752_v11 = vld [vmem:[%s1162_s1 + $0x50] ss:$8 sps:$4 sm:$0xff] (!%p143_p9)   ;;  %v753_v12 = vld [vmem:[%s1162_s1 + $0x64] ss:$8 sps:$4 sm:$0xff] (!%p143_p9)  }
  0x12   : > { %v755_v14 = vld [vmem:[%s1162_s1 + $0x60] ss:$8 sps:$4 sm:$0xff] (!%p143_p9)   ;;  %v756_v16 = vld [vmem:[%s1162_s1 + $0x74] ss:$8 sps:$4 sm:$0xff] (!%p143_p9)   ;;  %v758_v17 = vld [vmem:[%s1162_s1 + $0x70] ss:$8 sps:$4 sm:$0xff] (!%p143_p9)  }
  0x13   : > { %406 = vmatpush1.bf16.msra.mxu0 (!%p143_p9), %v740_v3  ;;  %679 = vmatpush1.bf16.msra.mxu1 (!%p143_p9), %v740_v3  ;;  %v759_v18 = vld [vmem:[%s1162_s1 + $0x84] ss:$8 sps:$4 sm:$0xff] (!%p143_p9)   ;;  %v761_v19 = vld [vmem:[%s1162_s1 + $0x80] ss:$8 sps:$4 sm:$0xff] (!%p143_p9)   ;;  %v762_v20 = vld [vmem:[%s1162_s1 + $0x94] ss:$8 sps:$4 sm:$0xff] (!%p143_p9)  }
  0x14   : > { %407 = vmatprep.subr.bf16.mxu0 (!%p143_p9), %v741_v4  ;;  %664 = vmatprep.subr.bf16.mxu1 (!%p143_p9), %v741_v4  ;;  %v764_v21 = vld [vmem:[%s1162_s1 + $0x90] ss:$8 sps:$4 sm:$0xff] (!%p143_p9)   ;;  %v765_v22 = vld [vmem:[%s1162_s1 + $0xa4] ss:$8 sps:$4 sm:$0xff] (!%p143_p9)   ;;  %v767_v23 = vld [vmem:[%s1162_s1 + $0xa0] ss:$8 sps:$4 sm:$0xff] (!%p143_p9)  }
  0x15   : > { %s1172_s7 = smov (!%p168_p10, %s614_s7), 7  ;;  %v768_v24 = vld [vmem:[%s1162_s1 + $0xb4] ss:$8 sps:$4 sm:$0xff]   ;;  %v770_v25 = vld [vmem:[%s1162_s1 + $0xb0] ss:$8 sps:$4 sm:$0xff]   ;;  %v215_v38 = vsub.s32 0, %v214_v37 }
  0x16   : > { %s659_s29 = sshll.u32 %s1172_s7, 3  ;;  %v771_v26 = vld [vmem:[%s1162_s1 + $0xc4] ss:$8 sps:$4 sm:$0xff]   ;;  %v773_v27 = vld [vmem:[%s1162_s1 + $0xc0] ss:$8 sps:$4 sm:$0xff]   ;;  %v219_v40 = vsub.s32 1, %v214_v37 }
  0x17   : > { %408 = vmatpush1.bf16.msra.mxu0 %v743_v5  ;;  %680 = vmatpush1.bf16.msra.mxu1 %v743_v5  ;;  %s988_s8 = scalar_lea.vmem %s1161_s0, %s659_s29  ;;  %v774_v28 = vld [vmem:[%s1162_s1 + $0xd4] ss:$8 sps:$4 sm:$0xff]   ;;  %v776_v29 = vld [vmem:[%s1162_s1 + $0xd0] ss:$8 sps:$4 sm:$0xff]   ;;  %v777_v30 = vld [vmem:[%s1162_s1 + $0xe4] ss:$8 sps:$4 sm:$0xff]  }
  0x18   : > { %409 = vmatprep.subr.bf16.mxu0 %v744_v6  ;;  %665 = vmatprep.subr.bf16.mxu1 %v744_v6  ;;  %v785_v13 = vld [vmem:[%s988_s8 + $0x4] ss:$8 sps:$4 sm:$0xff]   ;;  %v788_v15 = vld [vmem:[%s988_s8 + $0x14] ss:$8 sps:$4 sm:$0xff]   ;;  %v779_v31 = vld [vmem:[%s1162_s1 + $0xe0] ss:$8 sps:$4 sm:$0xff]  }
  0x19   : > { %435 = vmatprep.mubr.bf16.mxu0 %v785_v13  ;;  %445 = vmatprep.mubr.bf16.mxu1 %v788_v15  ;;  %v780_v32 = vld [vmem:[%s1162_s1 + $0xf4] ss:$8 sps:$4 sm:$0xff]   ;;  %v782_v33 = vld [vmem:[%s1162_s1 + $0xf0] ss:$8 sps:$4 sm:$0xff]   ;;  %v783_v34 = vld [vmem:[%s988_s8] ss:$8 sps:$4 sm:$0xff]  }
  0x1a   : > { %v786_v35 = vld [vmem:[%s988_s8 + $0x10] ss:$8 sps:$4 sm:$0xff]   ;;  %v211_v39 = vld [vmem:[%s1163_s2] sm:$0x3]  ;;  %s164_s8 = sand.u32 1, %s867_s13   ;;  %s661_s27 = sshll.u32 %s921_s16, 10 }
  0x1b   : > { %410 = vmatpush1.bf16.msra.mxu0 %v746_v7  ;;  %681 = vmatpush1.bf16.msra.mxu1 %v746_v7  ;;  %v216_v41 = vrot.slane %v211_v39, %v215_v38  ;;  %v220_v42 = vrot.slane %v211_v39, %v219_v40  ;;  %s613_s25 = sshll.u32 %s164_s8, 6  ;;  %s1112_s4 = scalar_lea.hbm %s1164_s3, %s661_s27 }
  0x1c   : > { %411 = vmatprep.subr.bf16.mxu0 %v747_v8  ;;  %666 = vmatprep.subr.bf16.mxu1 %v747_v8  ;;  %s166_s26 = scalar_lea.vmem [#allocation2], %s613_s25  ;;  %s1120_s16 = scalar_lea.sflag [#allocation3], %s164_s8 }
  0x1d   : > { %s547_s28 = sshll.u32 %s166_s26, 4  ;;  %s877_s6 = smov [#allocation2]   ;;  %s1114_s28 = int_to_ptr.vmem [resolvable:$true] %s547_s28 }
  0x1e   : > { %s813_s5 = scalar_lea.vmem %s1114_s28, 1024  ;;  %s817_s9 = sshll.u32 %s877_s6, 4  ;;  %s818_s9 = int_to_ptr.vmem [resolvable:$false] %s817_s9 }
  0x1f   : > { %412 = vmatpush1.bf16.msra.mxu0 %v749_v9  ;;  %682 = vmatpush1.bf16.msra.mxu1 %v749_v9  ;;  %p814_p11 = scmp.ne.s32.totalorder %s1114_s28, %s813_s5  ;;  %s819_s10 = scalar_lea.vmem %s818_s9, 2048 }
  0x20   : > { %413 = vmatprep.subr.bf16.mxu0 %v750_v10  ;;  %667 = vmatprep.subr.bf16.mxu1 %v750_v10  ;;  %p820_p0 = scmp.lt.s32.totalorder %s1114_s28, %s818_s9  ;;  %p821_p1 = scmp.lt.s32.totalorder %s819_s10, %s813_s5 }
  0x21   : > { %p815_p12 = pnand %p814_p11, %p938_p5 }
  0x22   : > { %p822_p2 = por %p821_p1, %p820_p0 }
  0x23   : > { %414 = vmatpush1.bf16.msra.mxu0 %v752_v11  ;;  %683 = vmatpush1.bf16.msra.mxu1 %v752_v11  ;;  %p816_p13 = pneg %p815_p12 }
  0x24   : > { %415 = vmatprep.subr.bf16.mxu0 %v753_v12  ;;  %668 = vmatprep.subr.bf16.mxu1 %v753_v12 }
  0x25   : > { %p823_p3 = pnand %p822_p2, %p816_p13 }
  0x27   : > { %416 = vmatpush1.bf16.msra.mxu0 %v755_v14  ;;  %684 = vmatpush1.bf16.msra.mxu1 %v755_v14 }
  0x28   : > { %417 = vmatprep.subr.bf16.mxu0 %v756_v16  ;;  %669 = vmatprep.subr.bf16.mxu1 %v756_v16 }
  0x2b   : > { %418 = vmatpush1.bf16.msra.mxu0 %v758_v17  ;;  %685 = vmatpush1.bf16.msra.mxu1 %v758_v17 }
  0x2c   : > { %419 = vmatprep.subr.bf16.mxu0 %v759_v18  ;;  %670 = vmatprep.subr.bf16.mxu1 %v759_v18 }
  0x2f   : > { %420 = vmatpush1.bf16.msra.mxu0 %v761_v19  ;;  %686 = vmatpush1.bf16.msra.mxu1 %v761_v19 }
  0x30   : > { %421 = vmatprep.subr.bf16.mxu0 %v762_v20  ;;  %671 = vmatprep.subr.bf16.mxu1 %v762_v20 }
  0x33   : > { %422 = vmatpush1.bf16.msra.mxu0 %v764_v21  ;;  %687 = vmatpush1.bf16.msra.mxu1 %v764_v21 }
  0x34   : > { %423 = vmatprep.subr.bf16.mxu0 %v765_v22  ;;  %672 = vmatprep.subr.bf16.mxu1 %v765_v22 }
  0x37   : > { %424 = vmatpush1.bf16.msra.mxu0 %v767_v23  ;;  %688 = vmatpush1.bf16.msra.mxu1 %v767_v23 }
  0x38   : > { %425 = vmatprep.subr.bf16.mxu0 %v768_v24  ;;  %673 = vmatprep.subr.bf16.mxu1 %v768_v24 }
  0x3b   : > { %426 = vmatpush1.bf16.msra.mxu0 %v770_v25  ;;  %689 = vmatpush1.bf16.msra.mxu1 %v770_v25 }
  0x3c   : > { %427 = vmatprep.subr.bf16.mxu0 %v771_v26  ;;  %674 = vmatprep.subr.bf16.mxu1 %v771_v26 }
  0x3f   : > { %428 = vmatpush1.bf16.msra.mxu0 %v773_v27  ;;  %690 = vmatpush1.bf16.msra.mxu1 %v773_v27 }
  0x40   : > { %429 = vmatprep.subr.bf16.mxu0 %v774_v28  ;;  %675 = vmatprep.subr.bf16.mxu1 %v774_v28 }
  0x43   : > { %430 = vmatpush1.bf16.msra.mxu0 %v776_v29  ;;  %691 = vmatpush1.bf16.msra.mxu1 %v776_v29 }
  0x44   : > { %431 = vmatprep.subr.bf16.mxu0 %v777_v30  ;;  %676 = vmatprep.subr.bf16.mxu1 %v777_v30 }
  0x47   : > { %432 = vmatpush1.bf16.msra.mxu0 %v779_v31  ;;  %692 = vmatpush1.bf16.msra.mxu1 %v779_v31 }
  0x48   : > { %433 = vmatprep.subr.bf16.mxu0 %v780_v32  ;;  %677 = vmatprep.subr.bf16.mxu1 %v780_v32 }
  0x4b   : > { %434 = vmatpush1.bf16.msra.mxu0 %v782_v33  ;;  %693 = vmatpush1.bf16.msra.mxu1 %v782_v33 }
  0x4e   : > { %436 = vmatmul.mubr.bf16.vlgmr.msra.gmra.mrb[0].mxu0 %v783_v34  ;;  %446 = vmatmul.mubr.bf16.vlgmr.msra.gmra.mrb[0].mxu1 %v786_v35 }
 0x121   : > { %v437_v43 = vpop.f32.mrb[0].mxu0  ;;  %v447_v44 = vpop.f32.mrb[0].mxu1 }
 0x122   : > { %v1057_v45 = vadd.f32 %v437_v43, %v216_v41  ;;  %v1059_v46 = vadd.f32 %v447_v44, %v216_v41  ;;  %v439_v47 = vpop.f32.mrb[1].mxu0  ;;  %v449_v48 = vpop.f32.mrb[1].mxu1 }
 0x123   : > { %v1061_v49 = vadd.f32 %v439_v47, %v220_v42  ;;  %v1063_v50 = vadd.f32 %v449_v48, %v220_v42  ;;  %v441_v51 = vpop.f32.mrb[2].mxu0  ;;  %v451_v52 = vpop.f32.mrb[2].mxu1 }
 0x124   : > { %v1065_v53 = vadd.f32 %v441_v51, %v216_v41  ;;  %v443_v54 = vpop.f32.mrb[3].mxu0  ;;  %v1067_v55 = vadd.f32 %v451_v52, %v216_v41  ;;  %v453_v56 = vpop.f32.mrb[3].mxu1 }
 0x125   : > { %v1069_v57 = vadd.f32 %v443_v54, %v220_v42  ;;  %v1071_v58 = vadd.f32 %v453_v56, %v220_v42  ;;  %v462_v59 = vmax.f32 %v1059_v46, %v1063_v50  ;;  %v456_v60 = vmax.f32 %v1057_v45, %v1061_v49 }
 0x127   : > { %463 = vmax.xlane.f32.xlu1 %v462_v59  ;;  %457 = vmax.xlane.f32.xlu0 %v456_v60  ;;  %v465_v61 = vmax.f32 %v1067_v55, %v1071_v58  ;;  %v459_v62 = vmax.f32 %v1065_v53, %v1069_v57 }
 0x12b   : > { %466 = vmax.xlane.f32.xlu1 %v465_v61  ;;  %460 = vmax.xlane.f32.xlu0 %v459_v62 }
 0x1b4   : > { %v1081_v63 = vpop.xlane.xlu1 %463  ;;  %v458_v0 = vpop.xlane.xlu0 %457 }
 0x1b5   : > { %v472_v1 = vsub.f32 %v1059_v46, %v1081_v63  ;;  %v468_v2 = vsub.f32 %v1057_v45, %v458_v0  ;;  %v469_v3 = vsub.f32 %v1061_v49, %v458_v0  ;;  %v473_v4 = vsub.f32 %v1063_v50, %v1081_v63 }
 0x1b7   : > { %v476_v5 = vmul.f32 1.442695, %v468_v2  ;;  %v478_v6 = vmul.f32 1.442695, %v469_v3  ;;  %v484_v9 = vmul.f32 1.442695, %v472_v1 }
 0x1b8   : > { %v1089_v7 = vpop.xlane.xlu1 %466  ;;  %v461_v8 = vpop.xlane.xlu0 %460  ;;  %v486_v12 = vmul.f32 1.442695, %v473_v4 }
 0x1b9   : > { %v474_v10 = vsub.f32 %v1067_v55, %v1089_v7  ;;  %v470_v11 = vsub.f32 %v1065_v53, %v461_v8  ;;  %v475_v13 = vsub.f32 %v1071_v58, %v1089_v7  ;;  %v471_v14 = vsub.f32 %v1069_v57, %v461_v8 }
 0x1ba   : > { %789 = vpow2.f32 %v476_v5 }
 0x1bb   : > { %v480_v15 = vmul.f32 1.442695, %v470_v11  ;;  %791 = vpow2.f32 %v478_v6  ;;  %v482_v16 = vmul.f32 1.442695, %v471_v14  ;;  %v488_v17 = vmul.f32 1.442695, %v474_v10 }
 0x1bc   : > { %793 = vpow2.f32 %v484_v9  ;;  %v490_v18 = vmul.f32 1.442695, %v475_v13 }
 0x1bd   : > { %795 = vpow2.f32 %v486_v12 }
 0x1be   : > { %797 = vpow2.f32 %v480_v15 }
 0x1bf   : > { %799 = vpow2.f32 %v482_v16 }
 0x1c0   : > { %801 = vpow2.f32 %v488_v17 }
 0x1c1   : > { %803 = vpow2.f32 %v490_v18 }
 0x1c4   : > { %v790_v19 = vpop.eup %789 }
 0x1c5   : > { %v792_v20 = vpop.eup %791 }
 0x1c6   : > { %v794_v21 = vpop.eup %793  ;;  %v492_v22 = vadd.f32 %v792_v20, %v790_v19 }
 0x1c7   : > { %v796_v23 = vpop.eup %795 }
 0x1c8   : > { %v798_v24 = vpop.eup %797  ;;  %493 = vadd.xlane.f32.xlu0 %v492_v22  ;;  %v498_v27 = vadd.f32 %v796_v23, %v794_v21 }
 0x1c9   : > { %v800_v25 = vpop.eup %799 }
 0x1ca   : > { %v802_v26 = vpop.eup %801  ;;  %v495_v28 = vadd.f32 %v800_v25, %v798_v24 }
 0x1cb   : > { %v804_v29 = vpop.eup %803 }
 0x1cc   : > { %499 = vadd.xlane.f32.xlu0 %v498_v27  ;;  %496 = vadd.xlane.f32.xlu1 %v495_v28  ;;  %v501_v30 = vadd.f32 %v804_v29, %v802_v26 }
 0x1d0   : > { %502 = vadd.xlane.f32.xlu1 %v501_v30 }
 0x255   : > { %v494_v31 = vpop.xlane.xlu0 %493 }
 0x256   : > { %805 = vlog2.f32 %v494_v31 }
 0x259   : > { %v497_v32 = vpop.xlane.xlu1 %496  ;;  %v500_v33 = vpop.xlane.xlu0 %499 }
 0x25a   : > { %807 = vlog2.f32 %v497_v32 }
 0x25b   : > { %809 = vlog2.f32 %v500_v33 }
 0x25d   : > { %v503_v34 = vpop.xlane.xlu1 %502 }
 0x25e   : > { %811 = vlog2.f32 %v503_v34 }
 0x260   : > { %v806_v35 = vpop.eup %805 }
 0x261   : > { %v505_v36 = vmul.f32 0.6931472, %v806_v35 }
 0x263   : > { %v512_v37 = vadd.f32 %v505_v36, %v458_v0 }
 0x264   : > { %v808_v38 = vpop.eup %807 }
 0x265   : > { %v810_v39 = vpop.eup %809  ;;  %v516_v40 = vsub.f32 %v1057_v45, %v512_v37  ;;  %v517_v41 = vsub.f32 %v1061_v49, %v512_v37  ;;  %v507_v42 = vmul.f32 0.6931472, %v808_v38 }
 0x266   : > { %v509_v43 = vmul.f32 0.6931472, %v810_v39 }
 0x267   : > { %524 = vst [vmem:[%s166_s26] sm:$0xff] %v516_v40  ;;  %525 = vst [vmem:[%s166_s26 + $0x8] sm:$0xff] %v517_v41  ;;  %v513_v44 = vadd.f32 %v507_v42, %v461_v8 }
 0x268   : > { %v812_v47 = vpop.eup %811  ;;  %v514_v48 = vadd.f32 %v509_v43, %v1081_v63 }
 0x269   : > { %v518_v51 = vsub.f32 %v1065_v53, %v513_v44  ;;  %v519_v52 = vsub.f32 %v1069_v57, %v513_v44  ;;  %v511_v54 = vmul.f32 0.6931472, %v812_v47 }
 0x26a   : > { %v520_v45 = vsub.f32 %v1059_v46, %v514_v48  ;;  %v521_v49 = vsub.f32 %v1063_v50, %v514_v48 }
 0x26b   : > { %526 = vst [vmem:[%s166_s26 + $0x10] sm:$0xff] %v518_v51  ;;  %527 = vst [vmem:[%s166_s26 + $0x18] sm:$0xff] %v519_v52  ;;  %v515_v56 = vadd.f32 %v511_v54, %v1089_v7 }
 0x26c   : > { %528 = vst [vmem:[%s166_s26 + $0x20] sm:$0xff] %v520_v45  ;;  %529 = vst [vmem:[%s166_s26 + $0x28] sm:$0xff] %v521_v49 }
 0x26d   : > { %v522_v46 = vsub.f32 %v1067_v55, %v515_v56  ;;  %v523_v50 = vsub.f32 %v1071_v58, %v515_v56 }
 0x26f   : > { %530 = vst [vmem:[%s166_s26 + $0x30] sm:$0xff] %v522_v46  ;;  %531 = vst [vmem:[%s166_s26 + $0x38] sm:$0xff] %v523_v50 }
 0x270   : > { %826 = shalt.err (!%p823_p3)
}
 0x271   : > { %s827_s7 = scalar_lea.hbm %s1112_s4, 1024  ;;  %s831_s19 = scalar_lea.hbm %s1164_s3, 2048 }
 0x272   : > { %p828_p4 = scmp.ne.s32.totalorder %s1112_s4, %s827_s7  ;;  %p832_p9 = scmp.lt.u32.totalorder %s1112_s4, %s1164_s3 }
 0x273   : > { %p833_p10 = scmp.lt.u32.totalorder %s831_s19, %s827_s7  ;;  %p835_p12 = scmp.lt.u32.totalorder %s827_s7, %s1112_s4 }
 0x274   : > { %p829_p7 = pnand %p828_p4, %p938_p5 }
 0x275   : > { %p834_p11 = por %p833_p10, %p832_p9 }
 0x276   : > { %p830_p8 = pneg %p829_p7 }
 0x277   : > { %p836_p13 = por %p835_p12, %p834_p11 }
 0x279   : > { %p837_p0 = pnand %p836_p13, %p830_p8 }
 0x27b   : > { %840 = shalt.err (!%p837_p0)
}
 0x27c   : > { %s878_s8 = smov 256   ;;  %s879_s25 = smov 16  }
 0x27d   : > { %694 = dma.vmem_to_hbm [thread:$0]  (%p938_p5), %s1114_s28, 1024, %s1112_s4, %s1120_s16, %s878_s8, %s878_s8, %s879_s25  }
 0x27e PF: > { %p700_p1 = scmp.ge.s32.totalorder %s875_s15, 2  ;;  %s562_s26 = sand.u32 1, %s863_s12  }
 0x27f   : > { %s563_s27 = scalar_lea.sflag [#allocation3], %s562_s26 }
 0x280   : > { %p697_p2 = pnand %p700_p1, %p942_p6 }
 0x282   : > { %858 = dma.done.wait (!%p697_p2), %s563_s27, 1024  }
 0x283   : > { %860 = vsyncadd (!%p697_p2), %s563_s27, 4294966272  ;;  %p13_p3 = scmp.ge.s32.totalorder %s925_s18, 4   ;;  %s1167_s12 = smov %s867_s13 }
 0x284   : > { %s1168_s13 = smov %s871_s14  ;;  %s1169_s14 = smov %s936_s21 }
 0x285   : > { %s1170_s15 = smov %s925_s18  ;;  %15 = sbr.rel (!%p13_p3) target bundleno = 3 (0x3), region = 67 }
 0x28c   :  { %568 = vsyncpa [#allocation3], 1 }
 0x28d   :  { %570 = vsyncpa [#allocation3 + $0x1], 1 }

// kernel: forward.3
= control target key start
LH: loop header
LB: loop body
LE: loop exit
PB: predicated region body
PF: predicated region fallthrough
CT: control target
= control target key end

     0   :  { %s1118_s21 = smov 0   ;;  %s1327_s0 = inlined_call_operand.vmem [shape: bf16[8,8,128], index: 0, kind: input, shape index: {}]   ;;  %s1328_s1 = inlined_call_operand.vmem [shape: bf16[128,384], index: 1, kind: input, shape index: {}]   ;;  %s1329_s2 = inlined_call_operand.vmem [shape: bf16[128,384], index: 2, kind: input, shape index: {}]   ;;  %s1330_s3 = inlined_call_operand.vmem [shape: f32[1,384], index: 3, kind: input, shape index: {}]   ;;  %s1331_s4 = inlined_call_operand.vmem [shape: f32[1,384], index: 4, kind: input, shape index: {}]   ;;  %s1332_s5 = inlined_call_operand.vmem [shape: bf16[8,8,128], index: 5, kind: output, shape index: {0}]   ;;  %s1333_s6 = inlined_call_operand.vmem [shape: f32[8,128], index: 6, kind: output, shape index: {1}]  }
   0x1 LB: > { %s1124_s22 = sadd.s32 4294967295, %s1077_s21   ;;  %p862_p0 = scmp.ge.s32.totalorder %s1077_s21, 1  ;;  %s1077_s21 = sphi %s1118_s21, %s17_s21  }
   0x2   : > { %p209_p1 = scmp.lt.s32.totalorder %s1077_s21, 9 }
   0x4   : > { %p210_p2 = pnand %p862_p0, %p209_p1 }
   0x5   : > { %p237_p3 = scmp.lt.s32.totalorder (!%p210_p2), %s1124_s22, 7  ;;  %p865_p4 = scmp.ne.s32.totalorder (!%p210_p2), %s1124_s22, 0 }
   0x6   : > { %213 = sbr.rel (%p210_p2) target bundleno = 349 (0x15d), region = 40 }
   0xd   : > { %s238_s23 = scalar_select %p237_p3, %s1124_s22, 7 }
   0xe   : > { %249 = sbr.rel (%p865_p4) target bundleno = 21 (0x15), region = 44  ;;  %v1079_v0 = vmov (!%p865_p4), 0.0  }
   0xf   : > { %s863_s24 = sshll.u32 %s238_s23, 2  ;;  %250 = vst [vmem:[#allocation2] sm:$0xff] (!%p865_p4), %v1079_v0 }
  0x10   : > { %s1133_s27 = scalar_lea.vmem %s1327_s0, %s863_s24  ;;  %s1138_s30 = scalar_lea.vmem %s1332_s5, %s863_s24 }
  0x15 PF: > { %v997_v1 = vld [vmem:[%s1328_s1 + $0x4] ss:$12 sps:$4 sm:$0xff]   ;;  %v999_v2 = vld [vmem:[%s1328_s1] ss:$12 sps:$4 sm:$0xff]   ;;  %v1080_v3 = vmov 0.0   ;;  %v1081_v4 = vmov 0   ;;  %v287_v58 = vlaneseq }
  0x16   : > { %937 = vmatprep.subr.bf16.mxu1 %v1080_v3  ;;  %462 = vmatprep.mubr.bf16.mxu0 %v1081_v4  ;;  %v1000_v5 = vld [vmem:[%s1328_s1 + $0x1c] ss:$12 sps:$4 sm:$0xff]   ;;  %vm1082_vm0 = vmmov 0   ;;  %v1002_v6 = vld [vmem:[%s1328_s1 + $0x18] ss:$12 sps:$4 sm:$0xff]   ;;  %p916_p5 = scmp.ne.s32.totalorder %s1124_s22, 7 }
  0x17   : > { %430 = vmatprep.subr.bf16.mxu0 %v997_v1  ;;  %953 = vmatprep.mubr.msk.bf16.mxu1 %vm1082_vm0, %v1080_v3  ;;  %v1003_v7 = vld [vmem:[%s1328_s1 + $0x34] ss:$12 sps:$4 sm:$0xff]   ;;  %v1005_v8 = vld [vmem:[%s1328_s1 + $0x30] ss:$12 sps:$4 sm:$0xff]   ;;  %v1006_v9 = vld [vmem:[%s1328_s1 + $0x4c] ss:$12 sps:$4 sm:$0xff]  }
  0x18   : > { %431 = vmatpush1.bf16.msra.mxu0 %v999_v2  ;;  %v1017_v10 = vld [vmem:[%s1328_s1 + $0x8] ss:$12 sps:$4 sm:$0xff]   ;;  %v1009_v12 = vld [vmem:[%s1328_s1 + $0x64] ss:$12 sps:$4 sm:$0xff]   ;;  %v1021_v13 = vld [vmem:[%s1328_s1 + $0x20] ss:$12 sps:$4 sm:$0xff]  }
  0x19   : > { %432 = vmatprep.subr.bf16.mxu0 %v1000_v5  ;;  %v1008_v11 = vld [vmem:[%s1328_s1 + $0x48] ss:$12 sps:$4 sm:$0xff]   ;;  %938 = vmatpush3.bf16.msra.mxu1 %v1017_v10  ;;  %v1011_v14 = vld [vmem:[%s1328_s1 + $0x60] ss:$12 sps:$4 sm:$0xff]   ;;  %v1023_v15 = vld [vmem:[%s1328_s1 + $0x38] ss:$12 sps:$4 sm:$0xff]  }
  0x1a   : > { %939 = vmatprep.subr.bf16.mxu1 %v1080_v3  ;;  %v1012_v16 = vld [vmem:[%s1328_s1 + $0x7c] ss:$12 sps:$4 sm:$0xff]   ;;  %v1014_v17 = vld [vmem:[%s1328_s1 + $0x78] ss:$12 sps:$4 sm:$0xff]   ;;  %v1015_v19 = vld [vmem:[%s1328_s1 + $0x94] ss:$12 sps:$4 sm:$0xff]  }
  0x1b   : > { %v1027_v18 = vld [vmem:[%s1328_s1 + $0x50] ss:$12 sps:$4 sm:$0xff]   ;;  %v1031_v21 = vld [vmem:[%s1328_s1 + $0x68] ss:$12 sps:$4 sm:$0xff]   ;;  %v1019_v22 = vld [vmem:[%s1328_s1 + $0xac] ss:$12 sps:$4 sm:$0xff]  }
  0x1c   : > { %433 = vmatpush1.bf16.msra.mxu0 %v1002_v6  ;;  %v1018_v20 = vld [vmem:[%s1328_s1 + $0x90] ss:$12 sps:$4 sm:$0xff]   ;;  %v1022_v23 = vld [vmem:[%s1328_s1 + $0xa8] ss:$12 sps:$4 sm:$0xff]   ;;  %v1035_v24 = vld [vmem:[%s1328_s1 + $0x80] ss:$12 sps:$4 sm:$0xff]  }
  0x1d   : > { %434 = vmatprep.subr.bf16.mxu0 %v1003_v7  ;;  %940 = vmatpush3.bf16.msra.mxu1 %v1021_v13  ;;  %v1026_v25 = vld [vmem:[%s1329_s2 + $0x4] ss:$12 sps:$4 sm:$0xff]   ;;  %v1024_v26 = vld [vmem:[%s1329_s2] ss:$12 sps:$4 sm:$0xff]   ;;  %v1030_v29 = vld [vmem:[%s1329_s2 + $0x1c] ss:$12 sps:$4 sm:$0xff]  }
  0x1e   : > { %941 = vmatprep.subr.bf16.mxu1 %v1080_v3  ;;  %v251_v27 = vld [vmem:[%s1133_s27] sm:$0xf]  ;;  %v1039_v28 = vld [vmem:[%s1328_s1 + $0x98] ss:$12 sps:$4 sm:$0xff]   ;;  %v1043_v31 = vld [vmem:[%s1328_s1 + $0xb0] ss:$12 sps:$4 sm:$0xff]  }
  0x1f   : > { %v1028_v30 = vld [vmem:[%s1329_s2 + $0x18] ss:$12 sps:$4 sm:$0xff]   ;;  %v1034_v32 = vld [vmem:[%s1329_s2 + $0x34] ss:$12 sps:$4 sm:$0xff]   ;;  %v1032_v33 = vld [vmem:[%s1329_s2 + $0x30] ss:$12 sps:$4 sm:$0xff]  }
  0x20   : > { %435 = vmatpush1.bf16.msra.mxu0 %v1005_v8  ;;  %v1050_v34 = vld [vmem:[%s1329_s2 + $0x8] ss:$12 sps:$4 sm:$0xff]   ;;  %v1038_v35 = vld [vmem:[%s1329_s2 + $0x4c] ss:$12 sps:$4 sm:$0xff]   ;;  %v1042_v38 = vld [vmem:[%s1329_s2 + $0x64] ss:$12 sps:$4 sm:$0xff]  }
  0x21   : > { %436 = vmatprep.subr.bf16.mxu0 %v1006_v9  ;;  %942 = vmatpush3.bf16.msra.mxu1 %v1023_v15  ;;  %v1036_v36 = vld [vmem:[%s1329_s2 + $0x48] ss:$12 sps:$4 sm:$0xff]   ;;  %v1054_v37 = vld [vmem:[%s1329_s2 + $0x20] ss:$12 sps:$4 sm:$0xff]   ;;  %v1055_v40 = vld [vmem:[%s1329_s2 + $0x38] ss:$12 sps:$4 sm:$0xff]  }
  0x22   : > { %943 = vmatprep.subr.bf16.mxu1 %v1080_v3  ;;  %v1040_v39 = vld [vmem:[%s1329_s2 + $0x60] ss:$12 sps:$4 sm:$0xff]   ;;  %v1046_v41 = vld [vmem:[%s1329_s2 + $0x7c] ss:$12 sps:$4 sm:$0xff]   ;;  %v1044_v42 = vld [vmem:[%s1329_s2 + $0x78] ss:$12 sps:$4 sm:$0xff]  }
  0x23   : > { %v1056_v43 = vld [vmem:[%s1329_s2 + $0x50] ss:$12 sps:$4 sm:$0xff]   ;;  %v1049_v44 = vld [vmem:[%s1329_s2 + $0x94] ss:$12 sps:$4 sm:$0xff]   ;;  %v1053_v47 = vld [vmem:[%s1329_s2 + $0xac] ss:$12 sps:$4 sm:$0xff]  }
  0x24   : > { %437 = vmatpush1.bf16.msra.mxu0 %v1008_v11  ;;  %v1047_v45 = vld [vmem:[%s1329_s2 + $0x90] ss:$12 sps:$4 sm:$0xff]   ;;  %v1057_v46 = vld [vmem:[%s1329_s2 + $0x68] ss:$12 sps:$4 sm:$0xff]   ;;  %v1296_v49 = vld [vmem:[#allocation2] sm:$0xff]  ;;  %v288_v59 = vshrl.u32 %v287_v58, 7 }
  0x25   : > { %438 = vmatprep.subr.bf16.mxu0 %v1009_v12  ;;  %944 = vmatpush3.bf16.msra.mxu1 %v1027_v18  ;;  %v1051_v48 = vld [vmem:[%s1329_s2 + $0xa8] ss:$12 sps:$4 sm:$0xff]   ;;  %v1058_v50 = vld [vmem:[%s1329_s2 + $0x80] ss:$12 sps:$4 sm:$0xff]   ;;  %v511_v51 = vpack.c.bf16 %v1296_v49, %v1296_v49  ;;  %v1059_v52 = vld [vmem:[%s1329_s2 + $0x98] ss:$12 sps:$4 sm:$0xff]  }
  0x26   : > { %945 = vmatprep.subr.bf16.mxu1 %v1080_v3  ;;  %v1060_v53 = vld [vmem:[%s1329_s2 + $0xb0] ss:$12 sps:$4 sm:$0xff]   ;;  %v289_v60 = vsub.s32 0, %v288_v59  ;;  %v544_v61 = vld [vmem:[%s1331_s4] sm:$0x7]  ;;  %v293_v63 = vsub.s32 1, %v288_v59 }
  0x27   : > { %v285_v62 = vld [vmem:[%s1330_s3] sm:$0x7] }
  0x28   : > { %439 = vmatpush1.bf16.msra.mxu0 %v1011_v14  ;;  %v290_v0 = vrot.slane %v285_v62, %v289_v60  ;;  %v549_v1 = vrot.slane %v544_v61, %v289_v60  ;;  %v294_v2 = vrot.slane %v285_v62, %v293_v63 }
  0x29   : > { %440 = vmatprep.subr.bf16.mxu0 %v1012_v16  ;;  %946 = vmatpush3.bf16.msra.mxu1 %v1031_v21 }
  0x2a   : > { %947 = vmatprep.subr.bf16.mxu1 %v1080_v3 }
  0x2c   : > { %441 = vmatpush1.bf16.msra.mxu0 %v1014_v17 }
  0x2d   : > { %442 = vmatprep.subr.bf16.mxu0 %v1015_v19  ;;  %948 = vmatpush3.bf16.msra.mxu1 %v1035_v24 }
  0x2e   : > { %949 = vmatprep.subr.bf16.mxu1 %v1080_v3 }
  0x30   : > { %443 = vmatpush1.bf16.msra.mxu0 %v1018_v20  ;;  %v297_v20 = vsub.s32 2, %v288_v59 }
  0x31   : > { %444 = vmatprep.subr.bf16.mxu0 %v1019_v22  ;;  %950 = vmatpush3.bf16.msra.mxu1 %v1039_v28 }
  0x32   : > { %951 = vmatprep.subr.bf16.mxu1 %v1080_v3  ;;  %v557_v21 = vrot.slane %v544_v61, %v297_v20 }
  0x34   : > { %445 = vmatpush1.bf16.msra.mxu0 %v1022_v23  ;;  %v298_v23 = vrot.slane %v285_v62, %v297_v20 }
  0x35   : > { %689 = vmatprep.subr.bf16.mxu0 %v1026_v25  ;;  %952 = vmatpush3.bf16.msra.mxu1 %v1043_v31 }
  0x36   : > { %957 = vmatprep.subr.bf16.mxu1 %v1080_v3 }
  0x37   : > { %463 = vmatmul.mubr.bf16.vlgmr.msra.gmra.mrb[0].mxu0 %v251_v27 }
  0x38   : > { %690 = vmatpush1.bf16.msra.mxu0 %v1024_v26  ;;  %721 = vmatprep.mubr.bf16.mxu0 %v1081_v4  ;;  %v977_v4 = vadd.f32 %v549_v1, %v290_v0 }
  0x39   : > { %691 = vmatprep.subr.bf16.mxu0 %v1030_v29  ;;  %954 = vmatmul.mubr.bf16.vlgmr.msra.gmra.mrb[0].mxu1 %v251_v27 }
  0x3a   : > { %958 = vmatpush3.bf16.msra.mxu1 %v1050_v34  ;;  %973 = vmatprep.mubr.msk.bf16.mxu1 %vm1082_vm0, %v1080_v3 }
  0x3b   : > { %959 = vmatprep.subr.bf16.mxu1 %v1080_v3 }
  0x3c   : > { %692 = vmatpush1.bf16.msra.mxu0 %v1028_v30 }
  0x3d   : > { %693 = vmatprep.subr.bf16.mxu0 %v1034_v32 }
  0x3e   : > { %960 = vmatpush3.bf16.msra.mxu1 %v1054_v37 }
  0x3f   : > { %961 = vmatprep.subr.bf16.mxu1 %v1080_v3 }
  0x40   : > { %694 = vmatpush1.bf16.msra.mxu0 %v1032_v33 }
  0x41   : > { %695 = vmatprep.subr.bf16.mxu0 %v1038_v35 }
  0x42   : > { %962 = vmatpush3.bf16.msra.mxu1 %v1055_v40 }
  0x43   : > { %963 = vmatprep.subr.bf16.mxu1 %v1080_v3 }
  0x44   : > { %696 = vmatpush1.bf16.msra.mxu0 %v1036_v36 }
  0x45   : > { %697 = vmatprep.subr.bf16.mxu0 %v1042_v38 }
  0x46   : > { %964 = vmatpush3.bf16.msra.mxu1 %v1056_v43 }
  0x47   : > { %965 = vmatprep.subr.bf16.mxu1 %v1080_v3 }
  0x48   : > { %698 = vmatpush1.bf16.msra.mxu0 %v1040_v39 }
  0x49   : > { %699 = vmatprep.subr.bf16.mxu0 %v1046_v41 }
  0x4a   : > { %966 = vmatpush3.bf16.msra.mxu1 %v1057_v46 }
  0x4b   : > { %967 = vmatprep.subr.bf16.mxu1 %v1080_v3 }
  0x4c   : > { %700 = vmatpush1.bf16.msra.mxu0 %v1044_v42 }
  0x4d   : > { %701 = vmatprep.subr.bf16.mxu0 %v1049_v44 }
  0x4e   : > { %968 = vmatpush3.bf16.msra.mxu1 %v1058_v50 }
  0x4f   : > { %969 = vmatprep.subr.bf16.mxu1 %v1080_v3 }
  0x50   : > { %702 = vmatpush1.bf16.msra.mxu0 %v1047_v45 }
  0x51   : > { %703 = vmatprep.subr.bf16.mxu0 %v1053_v47 }
  0x52   : > { %970 = vmatpush3.bf16.msra.mxu1 %v1059_v52 }
  0x53   : > { %971 = vmatprep.subr.bf16.mxu1 %v1080_v3  ;;  %v553_v3 = vrot.slane %v544_v61, %v293_v63 }
  0x54   : > { %704 = vmatpush1.bf16.msra.mxu0 %v1051_v48 }
  0x55   : > { %v979_v6 = vadd.f32 %v553_v3, %v294_v2 }
  0x56   : > { %972 = vmatpush3.bf16.msra.mxu1 %v1060_v53 }
  0x57   : > { %722 = vmatmul.mubr.bf16.vlgmr.msra.gmra.mrb[0].mxu0 %v511_v51 }
  0x59   : > { %974 = vmatmul.mubr.bf16.vlgmr.msra.gmra.mrb[4].mxu1 %v511_v51 }
 0x10c   : > { %v505_v54 = vpop.f32.mrb[0].mxu1 }
 0x10d   : > { %v955_v55 = vpop.f32.mrb[1].mxu1  ;;  %v506_v27 = vadd.f32 %v505_v54, %v298_v23 }
 0x10e   : > { %v508_v56 = vpop.f32.mrb[2].mxu1 }
 0x10f   : > { %v956_v57 = vpop.f32.mrb[3].mxu1 }
 0x12a   : > { %v723_v5 = vpop.f32.mrb[0].mxu0 }
 0x12b   : > { %v978_v7 = vadd.f32 %v977_v4, %v723_v5  ;;  %v725_v8 = vpop.f32.mrb[1].mxu0 }
 0x12c   : > { %v727_v9 = vpop.f32.mrb[2].mxu0  ;;  %v980_v12 = vadd.f32 %v979_v6, %v725_v8  ;;  %v764_v14 = vpop.f32.mrb[4].mxu1 }
 0x12d   : > { %v914_v10 = vmul.f32 -1.442695, %v978_v7  ;;  %v728_v11 = vpop.f32.mrb[3].mxu0  ;;  %v975_v15 = vpop.f32.mrb[5].mxu1  ;;  %v765_v25 = vadd.f32 %v764_v14, %v557_v21 }
 0x12e   : > { %v915_v13 = vmul.f32 -1.442695, %v980_v12  ;;  %v767_v16 = vpop.f32.mrb[6].mxu1 }
 0x12f   : > { %1061 = vpow2.f32 %v914_v10  ;;  %v976_v17 = vpop.f32.mrb[7].mxu1 }
 0x130   : > { %1063 = vpow2.f32 %v915_v13 }
 0x139   : > { %v1062_v18 = vpop.eup %1061 }
 0x13a   : > { %v774_v19 = vadd.f32 1.0, %v1062_v18  ;;  %v1064_v22 = vpop.eup %1063 }
 0x13b   : > { %v781_v24 = vadd.f32 1.0, %v1064_v22 }
 0x13c   : > { %1065 = vrcp.f32 %v774_v19 }
 0x13d   : > { %1067 = vrcp.f32 %v781_v24 }
 0x146   : > { %v1066_v26 = vpop.eup %1065 }
 0x147   : > { %v784_v28 = vmul.f32 %v1066_v26, %v765_v25  ;;  %v1068_v30 = vpop.eup %1067 }
 0x148   : > { %v787_v31 = vsub.f32 1.0, %v1068_v30  ;;  %v789_v33 = vmul.f32 %v1068_v30, %v1296_v49 }
 0x149   : > { %v785_v29 = vadd.f32 %v784_v28, %v506_v27 }
 0x14b   : > { %1069 = vtanh.f32 %v785_v29 }
 0x155   : > { %v1070_v32 = vpop.eup %1069 }
 0x156   : > { %v788_v34 = vmul.f32 %v1070_v32, %v787_v31  ;;  %797 = sbr.rel (%p916_p5) target bundleno = 349 (0x15d), region = 48 }
 0x158   : > { %v790_v35 = vadd.f32 %v789_v33, %v788_v34 }
 0x15a   : > { %791 = vst [vmem:[#allocation2] sm:$0xff] %v790_v35  ;;  %v792_v36 = vpack.c.bf16 %v790_v35, %v790_v35  ;;  %798 = vst [vmem:[%s1333_s6] sm:$0xff] (!%p916_p5), %v790_v35 }
 0x15c   : > { %793 = vst [vmem:[%s1138_s30] sm:$0xf] %v792_v36 }
 0x15d PF: > { %s17_s21 = sadd.s32 1, %s1077_s21  }
 0x15e   : > { %p14_p6 = scmp.ge.s32.totalorder %s17_s21, 10  }
 0x160   :  { %16 = sbr.rel (!%p14_p6) target bundleno = 1 (0x1), region = 86 }

// kernel: forward.4
= control target key start
LH: loop header
LB: loop body
LE: loop exit
PB: predicated region body
PF: predicated region fallthrough
CT: control target
= control target key end

     0   :  { %15 = vsyncpa [#allocation5], 0  ;;  %s2755_s0 = inlined_call_operand.vmem [shape: bf16[8,8,128], index: 0, kind: input, shape index: {}]   ;;  %s2756_s1 = inlined_call_operand.vmem [shape: bf16[8,8,128], index: 1, kind: input, shape index: {}]   ;;  %s2757_s2 = inlined_call_operand.vmem [shape: bf16[8,8,128], index: 2, kind: input, shape index: {}]   ;;  %s2758_s3 = inlined_call_operand.vmem [shape: f32[8,128], index: 3, kind: input, shape index: {}]   ;;  %s2759_s4 = inlined_call_operand.vmem [shape: bf16[256,384], index: 4, kind: input, shape index: {}]   ;;  %s2760_s5 = inlined_call_operand.vmem [shape: bf16[128,384], index: 5, kind: input, shape index: {}]   ;;  %s2761_s6 = inlined_call_operand.vmem [shape: f32[1,384], index: 6, kind: input, shape index: {}]   ;;  %s2762_s7 = inlined_call_operand.vmem [shape: f32[1,384], index: 7, kind: input, shape index: {}]   ;;  %s2763_s8 = inlined_call_operand.vmem [shape: bf16[8,8,256], index: 8, kind: output, shape index: {0}]   ;;  %s2764_s9 = inlined_call_operand.hbm [shape: f32[8,8,8], index: 9, kind: output, shape index: {1}]  }
   0x1   :  { %17 = vsyncpa [#allocation5 + $0x1], 0  ;;  %s2252_s30 = smov 0   ;;  %s2254_s10 = smov 0  }
   0x2   :  { %s2256_s11 = smov 0   ;;  %s2258_s12 = smov 0  }
   0x3 LB: > { %s2273_s13 = sadd.s32 4294967295, %s2194_s12   ;;  %s1761_s14 = sadd.s32 4294967294, %s2194_s12   ;;  %s2194_s12 = sphi %s2258_s12, %s2776_s12   ;;  %s2190_s11 = sphi %s2256_s11, %s2775_s11   ;;  %s2186_s10 = sphi %s2254_s10, %s2774_s10   ;;  %s2182_s30 = sphi %s2252_s30, %s2773_s30  }
   0x4   : > { %s2277_s15 = sadd.s32 1, %s2194_s12   ;;  %s229_s16 = sadd.s32 1, %s2190_s11 }
   0x5   : > { %s226_s17 = ssub.s32 %s2194_s12, %s2277_s15  ;;  %p239_p0 = scmp.ne.s32.totalorder %s2190_s11, %s2186_s10 }
   0x6   : > { %p227_p1 = scmp.eq.s32.totalorder %s226_s17, 0  ;;  %p240_p2 = scmp.eq.s32.totalorder %s2273_s13, 7 }
   0x7   : > { %p245_p3 = scmp.ne.s32.totalorder %s2186_s10, %s2182_s30  ;;  %p246_p4 = scmp.eq.s32.totalorder %s1761_s14, 7 }
   0x8   : > { %s2288_s18 = scalar_select %p227_p1, %s2190_s11, %s229_s16  }
   0x9   : > { %p2290_p5 = por %p240_p2, %p239_p0  ;;  %p2294_p6 = por %p246_p4, %p245_p3 }
   0xa   : > { %2766 = sst [smem:[#allocation7_spill]] %s2288_s18  ;;  %p1764_p7 = scmp.ge.s32.totalorder %s2194_s12, 1 }
   0xb   : > { %p292_p8 = scmp.lt.s32.totalorder %s2194_s12, 9 }
   0xd   : > { %p293_p9 = pnand %p1764_p7, %p292_p8 }
   0xe   : > { %s2765_s21 = sand.u32 (!%p293_p9), 1, %s2186_s10   ;;  %p332_p10 = scmp.lt.s32.totalorder (!%p293_p9), %s2273_s13, 7 }
   0xf   : > { %296 = sbr.rel (%p293_p9) target bundleno = 1217 (0x4c1), region = 52  ;;  %s2304_s22 = sshll.u32 (!%p293_p9), %s2765_s21, 3 }
  0x10   : > { %p1769_p11 = scmp.ne.s32.totalorder (!%p293_p9), %s2273_s13, 0 }
  0x16   : > { %s333_s23 = scalar_select %p332_p10, %s2273_s13, 7 }
  0x17   : > { %345 = sbr.rel (%p1769_p11) target bundleno = 30 (0x1e), region = 56  ;;  %v346_v0 = vld [vmem:[%s2758_s3] sm:$0xff] (!%p1769_p11)  ;;  %v2196_v1 = vmov (!%p1769_p11), 0.0  }
  0x18   : > { %s1766_s24 = sshll.u32 %s333_s23, 2  ;;  %s1856_s25 = sshll.u32 %s333_s23, 3  ;;  %347 = vst [vmem:[#allocation2] sm:$0xff] (!%p1769_p11), %v346_v0  ;;  %348 = vst [vmem:[#allocation3] sm:$0xff] (!%p1769_p11), %v2196_v1 }
  0x19   : > { %s2310_s28 = scalar_lea.vmem %s2755_s0, %s1766_s24  ;;  %s2315_s16 = scalar_lea.vmem %s2763_s8, %s1856_s25 }
  0x1e PF: > { %v2008_v2 = vld [vmem:[%s2759_s4 + $0x4] ss:$12 sps:$4 sm:$0xff]   ;;  %v2010_v3 = vld [vmem:[%s2759_s4] ss:$12 sps:$4 sm:$0xff]   ;;  %v2197_v4 = vmov 0   ;;  %v2198_v51 = vmov 0.0  }
  0x1f   : > { %2007 = vset.pattern.permute.xlu0 %v2197_v4  ;;  %2006 = vset.pattern.permute.xlu1 %v2197_v4  ;;  %v2011_v5 = vld [vmem:[%s2759_s4 + $0x1c] ss:$12 sps:$4 sm:$0xff]   ;;  %v2013_v6 = vld [vmem:[%s2759_s4 + $0x18] ss:$12 sps:$4 sm:$0xff]   ;;  %v2014_v7 = vld [vmem:[%s2759_s4 + $0x34] ss:$12 sps:$4 sm:$0xff]  }
  0x20   : > { %690 = vmatprep.subr.bf16.mxu0 %v2008_v2  ;;  %v2016_v8 = vld [vmem:[%s2759_s4 + $0x30] ss:$12 sps:$4 sm:$0xff]   ;;  %v2017_v9 = vld [vmem:[%s2759_s4 + $0x4c] ss:$12 sps:$4 sm:$0xff]   ;;  %v2019_v10 = vld [vmem:[%s2759_s4 + $0x48] ss:$12 sps:$4 sm:$0xff]  }
  0x21   : > { %691 = vmatpush1.bf16.msra.mxu0 %v2010_v3  ;;  %v2020_v11 = vld [vmem:[%s2759_s4 + $0x64] ss:$12 sps:$4 sm:$0xff]   ;;  %v2022_v12 = vld [vmem:[%s2759_s4 + $0x60] ss:$12 sps:$4 sm:$0xff]   ;;  %v2023_v13 = vld [vmem:[%s2759_s4 + $0x7c] ss:$12 sps:$4 sm:$0xff]  }
  0x22   : > { %692 = vmatprep.subr.bf16.mxu0 %v2011_v5  ;;  %v2025_v14 = vld [vmem:[%s2759_s4 + $0x78] ss:$12 sps:$4 sm:$0xff]   ;;  %v2050_v15 = vld [vmem:[%s2759_s4 + $0xc8] ss:$12 sps:$4 sm:$0xff]   ;;  %v2028_v17 = vld [vmem:[%s2759_s4 + $0x90] ss:$12 sps:$4 sm:$0xff]  }
  0x23   : > { %v2026_v16 = vld [vmem:[%s2759_s4 + $0x94] ss:$12 sps:$4 sm:$0xff]   ;;  %1903 = vmatprep.subr.bf16.mxu1 %v2050_v15  ;;  %v2029_v20 = vld [vmem:[%s2759_s4 + $0xac] ss:$12 sps:$4 sm:$0xff]   ;;  %v2032_v27 = vld [vmem:[%s2759_s4 + $0xc4] ss:$12 sps:$4 sm:$0xff]  }
  0x24   : > { %v2053_v18 = vld [vmem:[%s2759_s4 + $0x8] ss:$12 sps:$4 sm:$0xff]   ;;  %v2055_v19 = vld [vmem:[%s2759_s4 + $0xe0] ss:$12 sps:$4 sm:$0xff]   ;;  %v2060_v23 = vld [vmem:[%s2759_s4 + $0xf8] ss:$12 sps:$4 sm:$0xff]  }
  0x25   : > { %693 = vmatpush1.bf16.msra.mxu0 %v2013_v6  ;;  %1904 = vmatpush3.bf16.msra.mxu1 %v2053_v18  ;;  %v2058_v21 = vld [vmem:[%s2759_s4 + $0x20] ss:$12 sps:$4 sm:$0xff]   ;;  %v2031_v22 = vld [vmem:[%s2759_s4 + $0xa8] ss:$12 sps:$4 sm:$0xff]   ;;  %v2061_v26 = vld [vmem:[%s2759_s4 + $0x38] ss:$12 sps:$4 sm:$0xff]  }
  0x26   : > { %694 = vmatprep.subr.bf16.mxu0 %v2014_v7  ;;  %1905 = vmatprep.subr.bf16.mxu1 %v2055_v19  ;;  %v351_v24 = vld [vmem:[#allocation3] sm:$0xff]  ;;  %v2065_v29 = vld [vmem:[%s2759_s4 + $0x110] ss:$12 sps:$4 sm:$0xff]   ;;  %v2037_v33 = vld [vmem:[%s2759_s4 + $0xd8] ss:$12 sps:$4 sm:$0xff]   ;;  %vm2199_vm0 = vmmov 0  }
  0x27   : > { %v352_v25 = vpack.c.bf16 %v351_v24, %v351_v24  ;;  %v2034_v28 = vld [vmem:[%s2759_s4 + $0xc0] ss:$12 sps:$4 sm:$0xff]   ;;  %v2066_v30 = vld [vmem:[%s2759_s4 + $0x50] ss:$12 sps:$4 sm:$0xff]   ;;  %v2070_v32 = vld [vmem:[%s2759_s4 + $0x128] ss:$12 sps:$4 sm:$0xff]  }
  0x28   : > { %v2035_v31 = vld [vmem:[%s2759_s4 + $0xdc] ss:$12 sps:$4 sm:$0xff]   ;;  %v2038_v34 = vld [vmem:[%s2759_s4 + $0xf4] ss:$12 sps:$4 sm:$0xff]   ;;  %v2041_v38 = vld [vmem:[%s2759_s4 + $0x10c] ss:$12 sps:$4 sm:$0xff]  }
  0x29   : > { %695 = vmatpush1.bf16.msra.mxu0 %v2016_v8  ;;  %1906 = vmatpush3.bf16.msra.mxu1 %v2058_v21  ;;  %v2071_v35 = vld [vmem:[%s2759_s4 + $0x68] ss:$12 sps:$4 sm:$0xff]   ;;  %v2075_v36 = vld [vmem:[%s2759_s4 + $0x140] ss:$12 sps:$4 sm:$0xff]   ;;  %v2040_v37 = vld [vmem:[%s2759_s4 + $0xf0] ss:$12 sps:$4 sm:$0xff]  }
  0x2a   : > { %696 = vmatprep.subr.bf16.mxu0 %v2017_v9  ;;  %1907 = vmatprep.subr.bf16.mxu1 %v2060_v23  ;;  %v2076_v39 = vld [vmem:[%s2759_s4 + $0x80] ss:$12 sps:$4 sm:$0xff]   ;;  %v2080_v40 = vld [vmem:[%s2759_s4 + $0x158] ss:$12 sps:$4 sm:$0xff]   ;;  %v2043_v41 = vld [vmem:[%s2759_s4 + $0x108] ss:$12 sps:$4 sm:$0xff]  }
  0x2b   : > { %722 = vmatprep.mubr.bf16.mxu0 %v352_v25  ;;  %763 = vmatprep.mubr.bf16.mxu1 %v352_v25  ;;  %v2044_v42 = vld [vmem:[%s2759_s4 + $0x124] ss:$12 sps:$4 sm:$0xff]   ;;  %v2046_v45 = vld [vmem:[%s2759_s4 + $0x120] ss:$12 sps:$4 sm:$0xff]   ;;  %v2047_v47 = vld [vmem:[%s2759_s4 + $0x13c] ss:$12 sps:$4 sm:$0xff]  }
  0x2c   : > { %v2081_v43 = vld [vmem:[%s2759_s4 + $0x98] ss:$12 sps:$4 sm:$0xff]   ;;  %v2085_v44 = vld [vmem:[%s2759_s4 + $0x170] ss:$12 sps:$4 sm:$0xff]   ;;  %v2093_v49 = vld [vmem:[%s2760_s5 + $0x8] ss:$12 sps:$4 sm:$0xff]  }
  0x2d   : > { %697 = vmatpush1.bf16.msra.mxu0 %v2019_v10  ;;  %1908 = vmatpush3.bf16.msra.mxu1 %v2061_v26  ;;  %v2086_v46 = vld [vmem:[%s2759_s4 + $0xb0] ss:$12 sps:$4 sm:$0xff]   ;;  %v2049_v48 = vld [vmem:[%s2759_s4 + $0x138] ss:$12 sps:$4 sm:$0xff]   ;;  %v2051_v50 = vld [vmem:[%s2759_s4 + $0x154] ss:$12 sps:$4 sm:$0xff]  }
  0x2e   : > { %698 = vmatprep.subr.bf16.mxu0 %v2020_v11  ;;  %1909 = vmatprep.subr.bf16.mxu1 %v2065_v29  ;;  %v349_v52 = vld [vmem:[%s2310_s28] sm:$0xf]  ;;  %v2054_v53 = vld [vmem:[%s2759_s4 + $0x150] ss:$12 sps:$4 sm:$0xff]   ;;  %v2056_v55 = vld [vmem:[%s2759_s4 + $0x16c] ss:$12 sps:$4 sm:$0xff]  }
  0x2f   : > { %v2097_v54 = vld [vmem:[%s2760_s5 + $0x20] ss:$12 sps:$4 sm:$0xff]   ;;  %v2059_v56 = vld [vmem:[%s2759_s4 + $0x168] ss:$12 sps:$4 sm:$0xff]   ;;  %v2098_v57 = vld [vmem:[%s2760_s5 + $0x38] ss:$12 sps:$4 sm:$0xff]  }
  0x30   : > { %v2064_v58 = vld [vmem:[%s2760_s5 + $0x4] ss:$12 sps:$4 sm:$0xff]   ;;  %v2062_v59 = vld [vmem:[%s2760_s5] ss:$12 sps:$4 sm:$0xff]   ;;  %v2069_v60 = vld [vmem:[%s2760_s5 + $0x1c] ss:$12 sps:$4 sm:$0xff]  }
  0x31   : > { %699 = vmatpush1.bf16.msra.mxu0 %v2022_v12  ;;  %1910 = vmatpush3.bf16.msra.mxu1 %v2066_v30  ;;  %v2099_v61 = vld [vmem:[%s2760_s5 + $0x50] ss:$12 sps:$4 sm:$0xff]   ;;  %v2067_v62 = vld [vmem:[%s2760_s5 + $0x18] ss:$12 sps:$4 sm:$0xff]   ;;  %v2074_v63 = vld [vmem:[%s2760_s5 + $0x34] ss:$12 sps:$4 sm:$0xff]  }
  0x32   : > { %700 = vmatprep.subr.bf16.mxu0 %v2023_v13  ;;  %1911 = vmatprep.subr.bf16.mxu1 %v2070_v32  ;;  %v2100_v0 = vld [vmem:[%s2760_s5 + $0x68] ss:$12 sps:$4 sm:$0xff]   ;;  %v2072_v1 = vld [vmem:[%s2760_s5 + $0x30] ss:$12 sps:$4 sm:$0xff]   ;;  %v2079_v2 = vld [vmem:[%s2760_s5 + $0x4c] ss:$12 sps:$4 sm:$0xff]  }
  0x33   : > { %v2101_v3 = vld [vmem:[%s2760_s5 + $0x80] ss:$12 sps:$4 sm:$0xff]   ;;  %v2084_v5 = vld [vmem:[%s2760_s5 + $0x64] ss:$12 sps:$4 sm:$0xff]   ;;  %v2089_v8 = vld [vmem:[%s2760_s5 + $0x7c] ss:$12 sps:$4 sm:$0xff]  }
  0x34   : > { %v2102_v6 = vld [vmem:[%s2760_s5 + $0x98] ss:$12 sps:$4 sm:$0xff]   ;;  %v2082_v7 = vld [vmem:[%s2760_s5 + $0x60] ss:$12 sps:$4 sm:$0xff]   ;;  %v2103_v9 = vld [vmem:[%s2760_s5 + $0xb0] ss:$12 sps:$4 sm:$0xff]  }
  0x35   : > { %701 = vmatpush1.bf16.msra.mxu0 %v2025_v14  ;;  %1912 = vmatpush3.bf16.msra.mxu1 %v2071_v35  ;;  %v2527_v10 = vld [vmem:[#allocation2] sm:$0xff]  ;;  %v2090_v14 = vld [vmem:[%s2760_s5 + $0x90] ss:$12 sps:$4 sm:$0xff]   ;;  %v2096_v15 = vld [vmem:[%s2760_s5 + $0xac] ss:$12 sps:$4 sm:$0xff]   ;;  %vm1223_vm1 = vcmask 1041409  }
  0x36   : > { %702 = vmatprep.subr.bf16.mxu0 %v2026_v16  ;;  %1913 = vmatprep.subr.bf16.mxu1 %v2075_v36  ;;  %v2087_v11 = vld [vmem:[%s2760_s5 + $0x78] ss:$12 sps:$4 sm:$0xff]   ;;  %v2092_v12 = vld [vmem:[%s2760_s5 + $0x94] ss:$12 sps:$4 sm:$0xff]   ;;  %v771_v13 = vpack.c.bf16 %v2527_v10, %v2527_v10  ;;  %vm1225_vm2 = vcmask 1042434   ;;  %vm1227_vm3 = vcmask 1043459  }
  0x37   : > { %v2094_v16 = vld [vmem:[%s2760_s5 + $0xa8] ss:$12 sps:$4 sm:$0xff]   ;;  %v417_v26 = vld [vmem:[%s2761_s6] sm:$0x7]  ;;  %vm1229_vm4 = vcmask 1044484   ;;  %vm1231_vm5 = vcmask 1045509  }
  0x38   : > { %vm1233_vm6 = vcmask 1046534   ;;  %vm1235_vm7 = vcmask 1047559   ;;  %vm1238_vm8 = vcmask 64512   ;;  %s1853_s28 = sshll.u32 %s2273_s13, 7  ;;  %s2769_s14 = scalar_lea.vmem [#allocation4], %s2304_s22 }
  0x39   : > { %703 = vmatpush1.bf16.msra.mxu0 %v2028_v17  ;;  %1914 = vmatpush3.bf16.msra.mxu1 %v2076_v39  ;;  %s1677_s23 = sshll.u32 %s2769_s14, 4  ;;  %s2692_s26 = scalar_lea.hbm %s2764_s9, %s1853_s28  ;;  %s2694_s23 = int_to_ptr.vmem [resolvable:$true] %s1677_s23 }
  0x3a   : > { %704 = vmatprep.subr.bf16.mxu0 %v2029_v20  ;;  %1915 = vmatprep.subr.bf16.mxu1 %v2080_v40  ;;  %s2770_s17 = smov %s2769_s14  ;;  %s2771_s27 = sand.u32 1, %s2186_s10  }
  0x3b   : > { %s1661_s18 = scalar_lea.sflag [#allocation5], %s2771_s27  ;;  %s2132_s21 = scalar_lea.vmem %s2694_s23, 128 }
  0x3c   : > { %p2133_p12 = scmp.ne.s32.totalorder %s2694_s23, %s2132_s21  ;;  %s2201_s25 = smov [#allocation4]  }
  0x3d   : > { %705 = vmatpush1.bf16.msra.mxu0 %v2031_v22  ;;  %1916 = vmatpush3.bf16.msra.mxu1 %v2081_v43  ;;  %v419_v22 = vlaneseq  ;;  %s2136_s29 = sshll.u32 %s2201_s25, 4  ;;  %s2137_s29 = int_to_ptr.vmem [resolvable:$false] %s2136_s29 }
  0x3e   : > { %706 = vmatprep.subr.bf16.mxu0 %v2032_v27  ;;  %1917 = vmatprep.subr.bf16.mxu1 %v2085_v44  ;;  %v804_v27 = vld [vmem:[%s2762_s7] sm:$0x7]  ;;  %p2134_p13 = pnand %p2133_p12, %p2290_p5  ;;  %s2138_s28 = scalar_lea.vmem %s2137_s29, 256 }
  0x3f   : > { %v2547_v23 = vshrl.u32 %v419_v22, 7  ;;  %p2139_p1 = scmp.lt.s32.totalorder %s2694_s23, %s2137_s29  ;;  %p2140_p2 = scmp.lt.s32.totalorder %s2138_s28, %s2132_s21 }
  0x40   : > { %p2135_p0 = pneg %p2134_p13 }
  0x41   : > { %707 = vmatpush1.bf16.msra.mxu0 %v2034_v28  ;;  %1918 = vmatpush3.bf16.msra.mxu1 %v2086_v46  ;;  %v2550_v24 = vsub.s32 0, %v2547_v23  ;;  %v2559_v30 = vsub.s32 1, %v2547_v23  ;;  %p2141_p3 = por %p2140_p2, %p2139_p1 }
  0x42   : > { %708 = vmatprep.subr.bf16.mxu0 %v2035_v31  ;;  %1934 = vmatprep.subr.bf16.mxu1 %v2198_v51 }
  0x43   : > { %v422_v32 = vrot.slane %v417_v26, %v2550_v24  ;;  %v813_v35 = vrot.slane %v804_v27, %v2559_v30  ;;  %p2142_p4 = pnand %p2141_p3, %p2135_p0 }
  0x44   : > { %764 = vmatmul.mubr.bf16.vlgmr.msra.gmra.mrb[0].mxu1 %v349_v52 }
  0x45   : > { %709 = vmatpush1.bf16.msra.mxu0 %v2037_v33  ;;  %1935 = vmatpush3.bf16.msra.mxu1 %v2093_v49  ;;  %v809_v33 = vrot.slane %v804_v27, %v2550_v24 }
  0x46   : > { %710 = vmatprep.subr.bf16.mxu0 %v2038_v34  ;;  %1936 = vmatprep.subr.bf16.mxu1 %v2198_v51  ;;  %v426_v34 = vrot.slane %v417_v26, %v2559_v30 }
  0x47   : > { %1950 = vmatprep.mubr.msk.bf16.mxu1 %vm2199_vm0, %v2198_v51  ;;  %v1954_v36 = vadd.f32 %v809_v33, %v422_v32 }
  0x49   : > { %711 = vmatpush1.bf16.msra.mxu0 %v2040_v37  ;;  %1937 = vmatpush3.bf16.msra.mxu1 %v2097_v54 }
  0x4a   : > { %712 = vmatprep.subr.bf16.mxu0 %v2041_v38  ;;  %1938 = vmatprep.subr.bf16.mxu1 %v2198_v51  ;;  %v1956_v38 = vadd.f32 %v813_v35, %v426_v34 }
  0x4d   : > { %713 = vmatpush1.bf16.msra.mxu0 %v2043_v41  ;;  %1939 = vmatpush3.bf16.msra.mxu1 %v2098_v57 }
  0x4e   : > { %714 = vmatprep.subr.bf16.mxu0 %v2044_v42  ;;  %1940 = vmatprep.subr.bf16.mxu1 %v2198_v51 }
  0x51   : > { %715 = vmatpush1.bf16.msra.mxu0 %v2046_v45  ;;  %1941 = vmatpush3.bf16.msra.mxu1 %v2099_v61 }
  0x52   : > { %716 = vmatprep.subr.bf16.mxu0 %v2047_v47  ;;  %1942 = vmatprep.subr.bf16.mxu1 %v2198_v51 }
  0x55   : > { %717 = vmatpush1.bf16.msra.mxu0 %v2049_v48  ;;  %1943 = vmatpush3.bf16.msra.mxu1 %v2100_v0  ;;  %v2566_v48 = vsub.s32 2, %v2547_v23 }
  0x56   : > { %718 = vmatprep.subr.bf16.mxu0 %v2051_v50  ;;  %1944 = vmatprep.subr.bf16.mxu1 %v2198_v51 }
  0x57   : > { %v817_v49 = vrot.slane %v804_v27, %v2566_v48  ;;  %v1898_v27 = vld [vmem:[%s2757_s2 + $0x10] sm:$0xff]  }
  0x58   : > { %v1875_v34 = vunpack.c.l.bf16 %v1898_v27 }
  0x59   : > { %719 = vmatpush1.bf16.msra.mxu0 %v2054_v53  ;;  %1945 = vmatpush3.bf16.msra.mxu1 %v2101_v3 }
  0x5a   : > { %720 = vmatprep.subr.bf16.mxu0 %v2056_v55  ;;  %1946 = vmatprep.subr.bf16.mxu1 %v2198_v51 }
  0x5d   : > { %721 = vmatpush1.bf16.msra.mxu0 %v2059_v56  ;;  %1947 = vmatpush3.bf16.msra.mxu1 %v2102_v6 }
  0x5e   : > { %949 = vmatprep.subr.bf16.mxu0 %v2064_v58  ;;  %1948 = vmatprep.subr.bf16.mxu1 %v2198_v51  ;;  %v430_v51 = vrot.slane %v417_v26, %v2566_v48  ;;  %v2200_v58 = vmov 1966171168  }
  0x60   : > { %723 = vmatmul.mubr.bf16.vlgmr.msra.gmra.mrb[0].mxu0 %v349_v52 }
  0x61   : > { %950 = vmatpush1.bf16.msra.mxu0 %v2062_v59  ;;  %981 = vmatprep.mubr.bf16.mxu0 %v2197_v4  ;;  %v2077_v4 = vld [vmem:[%s2760_s5 + $0x48] ss:$12 sps:$4 sm:$0xff]   ;;  %v1062_v59 = vunpack.c.l.s4 %v2200_v58 }
  0x62   : > { %951 = vmatprep.subr.bf16.mxu0 %v2069_v60  ;;  %1949 = vmatpush3.bf16.msra.mxu1 %v2103_v9 }
  0x63   : > { %v1063_v61 = vunpack.c.0.s8 %v1062_v59 }
  0x65   : > { %952 = vmatpush1.bf16.msra.mxu0 %v2067_v62  ;;  %1951 = vmatmul.mubr.bf16.vlgmr.msra.gmra.mrb[4].mxu1 %v771_v13 }
  0x66   : > { %953 = vmatprep.subr.bf16.mxu0 %v2074_v63 }
  0x69   : > { %954 = vmatpush1.bf16.msra.mxu0 %v2072_v1 }
  0x6a   : > { %955 = vmatprep.subr.bf16.mxu0 %v2079_v2  ;;  %v1066_v2 = vsub.s32 %v1063_v61, %v2547_v23 }
  0x6d   : > { %956 = vmatpush1.bf16.msra.mxu0 %v2077_v4  ;;  %v1866_v4 = vld [vmem:[%s2757_s2] sm:$0xff]  }
  0x6e   : > { %957 = vmatprep.subr.bf16.mxu0 %v2084_v5  ;;  %v1867_v9 = vunpack.c.l.bf16 %v1866_v4 }
  0x71   : > { %958 = vmatpush1.bf16.msra.mxu0 %v2082_v7 }
  0x72   : > { %959 = vmatprep.subr.bf16.mxu0 %v2089_v8  ;;  %v1897_v8 = vld [vmem:[%s2757_s2 + $0x8] sm:$0xff]  }
  0x75   : > { %960 = vmatpush1.bf16.msra.mxu0 %v2087_v11 }
  0x76   : > { %961 = vmatprep.subr.bf16.mxu0 %v2092_v12 }
  0x79   : > { %962 = vmatpush1.bf16.msra.mxu0 %v2090_v14  ;;  %v1871_v14 = vunpack.c.l.bf16 %v1897_v8 }
  0x7a   : > { %963 = vmatprep.subr.bf16.mxu0 %v2096_v15 }
  0x7d   : > { %964 = vmatpush1.bf16.msra.mxu0 %v2094_v16 }
  0x80   : > { %982 = vmatmul.mubr.bf16.vlgmr.msra.gmra.mrb[0].mxu0 %v771_v13 }
 0x117   : > { %v1919_v17 = vpop.f32.mrb[0].mxu1 }
 0x118   : > { %v1920_v18 = vpop.f32.mrb[1].mxu1 }
 0x119   : > { %v1921_v19 = vadd.f32 %v1920_v18, %v1919_v17  ;;  %v1922_v20 = vpop.f32.mrb[2].mxu1  ;;  %v1868_v17 = vunpack.c.h.bf16 %v1866_v4 }
 0x11a   : > { %v1923_v21 = vpop.f32.mrb[3].mxu1 }
 0x11b   : > { %v766_v55 = vadd.f32 %v1921_v19, %v430_v51  ;;  %v1190_v51 = vand.u32 127, %v419_v22 }
 0x138   : > { %v1024_v25 = vpop.f32.mrb[4].mxu1 }
 0x139   : > { %v1952_v28 = vpop.f32.mrb[5].mxu1  ;;  %v1025_v53 = vadd.f32 %v1024_v25, %v817_v49 }
 0x13a   : > { %v1027_v29 = vpop.f32.mrb[6].mxu1 }
 0x13b   : > { %v1953_v31 = vpop.f32.mrb[7].mxu1  ;;  %v1872_v29 = vunpack.c.h.bf16 %v1897_v8 }
 0x153   : > { %v983_v37 = vpop.f32.mrb[0].mxu0 }
 0x154   : > { %v1955_v39 = vadd.f32 %v1954_v36, %v983_v37  ;;  %v985_v40 = vpop.f32.mrb[1].mxu0  ;;  %v1899_v37 = vld [vmem:[%s2757_s2 + $0x18] sm:$0xff]  }
 0x155   : > { %v987_v41 = vpop.f32.mrb[2].mxu0  ;;  %v1957_v44 = vadd.f32 %v1956_v38, %v985_v40 }
 0x156   : > { %v1842_v42 = vmul.f32 -1.442695, %v1955_v39  ;;  %v988_v43 = vpop.f32.mrb[3].mxu0  ;;  %v1876_v39 = vunpack.c.h.bf16 %v1898_v27  ;;  %v1265_v27 = vsub.s32 5, %v2547_v23 }
 0x157   : > { %v1843_v45 = vmul.f32 -1.442695, %v1957_v44  ;;  %v1879_v43 = vunpack.c.l.bf16 %v1899_v37 }
 0x158   : > { %2104 = vpow2.f32 %v1842_v42 }
 0x159   : > { %2106 = vpow2.f32 %v1843_v45 }
 0x162   : > { %v2105_v46 = vpop.eup %2104 }
 0x163   : > { %v1034_v47 = vadd.f32 1.0, %v2105_v46  ;;  %v2107_v50 = vpop.eup %2106  ;;  %v1880_v46 = vunpack.c.h.bf16 %v1899_v37 }
 0x164   : > { %v1041_v52 = vadd.f32 1.0, %v2107_v50 }
 0x165   : > { %2108 = vrcp.f32 %v1034_v47 }
 0x166   : > { %2110 = vrcp.f32 %v1041_v52 }
 0x16f   : > { %v2109_v54 = vpop.eup %2108 }
 0x170   : > { %v1044_v56 = vmul.f32 %v2109_v54, %v1025_v53  ;;  %v2111_v60 = vpop.eup %2110  ;;  %v2595_v53 = vsub.s32 %v1190_v51, %v2547_v23 }
 0x171   : > { %v1047_v62 = vsub.f32 1.0, %v2111_v60  ;;  %v1049_v0 = vmul.f32 %v2111_v60, %v2527_v10 }
 0x172   : > { %v1045_v57 = vadd.f32 %v1044_v56, %v766_v55 }
 0x174   : > { %2112 = vtanh.f32 %v1045_v57 }
 0x17e   : > { %v2113_v63 = vpop.eup %2112 }
 0x17f   : > { %v1048_v1 = vmul.f32 %v2113_v63, %v1047_v62 }
 0x181   : > { %v1050_v3 = vadd.f32 %v1049_v0, %v1048_v1 }
 0x183   : > { %v1067_v5 = vrot.slane %v1050_v3, %v1066_v2  ;;  %1544 = vst [vmem:[#allocation2] sm:$0xff] %v1050_v3  ;;  %v1562_v6 = vpack.c.bf16 %v1050_v3, %v1050_v3  ;;  %v1060_v7 = vcombine.high %v1050_v3, %v1050_v3 }
 0x185   : > { %v1083_v11 = vrot.slane %v1067_v5, %v1066_v2  ;;  %1563 = vst [vmem:[%s2315_s16] sm:$0xf] %v1562_v6  ;;  %v1075_v10 = vcombine.high %v1067_v5, %v1067_v5  ;;  %v1074_v12 = vrot.slane %v1060_v7, %v1066_v2 }
 0x187   : > { %v1120_v13 = vrot.slane %v1083_v11, %v2550_v24  ;;  %v1105_v15 = vcombine.high %v1083_v11, %v1083_v11  ;;  %v1097_v16 = vrot.slane %v1075_v10, %v1066_v2  ;;  %v1090_v18 = vrot.slane %v1074_v12, %v1066_v2 }
 0x188   : > { %v1076_v19 = vcombine.high %v1074_v12, %v1074_v12  ;;  %v1257_v12 = vsub.s32 3, %v2547_v23 }
 0x189   : > { %v1157_v20 = vmul.f32 %v1867_v9, %v1120_v13  ;;  %v1128_v21 = vrot.slane %v1105_v15, %v2550_v24  ;;  %v1124_v25 = vrot.slane %v1097_v16, %v2550_v24  ;;  %v1107_v26 = vcombine.high %v1097_v16, %v1097_v16 }
 0x18a   : > { %v1104_v32 = vrot.slane %v1076_v19, %v1066_v2  ;;  %v1136_v35 = vrot.slane %v1090_v18, %v2550_v24  ;;  %v1106_v36 = vcombine.high %v1090_v18, %v1090_v18 }
 0x18b   : > { %1165 = vadd.xlane.f32.xlu0 %v1157_v20  ;;  %v1159_v28 = vmul.f32 %v1871_v14, %v1128_v21  ;;  %v1132_v31 = vrot.slane %v1107_v26, %v2550_v24  ;;  %v1158_v33 = vmul.f32 %v1868_v17, %v1124_v25  ;;  %v1261_v17 = vsub.s32 4, %v2547_v23 }
 0x18c   : > { %v1140_v40 = vrot.slane %v1104_v32, %v2550_v24  ;;  %v1108_v41 = vcombine.high %v1104_v32, %v1104_v32  ;;  %v1161_v42 = vmul.f32 %v1875_v34, %v1136_v35  ;;  %v1144_v44 = vrot.slane %v1106_v36, %v2550_v24 }
 0x18d   : > { %1169 = vadd.xlane.f32.xlu1 %v1159_v28  ;;  %v1160_v38 = vmul.f32 %v1872_v29, %v1132_v31  ;;  %v1269_v32 = vsub.s32 6, %v2547_v23  ;;  %v1273_v36 = vsub.s32 7, %v2547_v23 }
 0x18e   : > { %v1162_v45 = vmul.f32 %v1876_v39, %v1140_v40  ;;  %v1148_v47 = vrot.slane %v1108_v41, %v2550_v24  ;;  %v1163_v49 = vmul.f32 %v1879_v43, %v1144_v44 }
 0x18f   : > { %1167 = vadd.xlane.f32.xlu0 %v1158_v33 }
 0x190   : > { %v1164_v50 = vmul.f32 %v1880_v46, %v1148_v47 }
 0x191   : > { %1171 = vadd.xlane.f32.xlu1 %v1160_v38 }
 0x193   : > { %1173 = vadd.xlane.f32.xlu0 %v1161_v42 }
 0x195   : > { %1175 = vadd.xlane.f32.xlu1 %v1162_v45 }
 0x197   : > { %1177 = vadd.xlane.f32.xlu0 %v1163_v49 }
 0x199   : > { %1179 = vadd.xlane.f32.xlu1 %v1164_v50 }
 0x218   : > { %v1166_v52 = vpop.xlane.xlu0 %1165 }
 0x219   : > { %v1194_v56 = vrot.slane %v1166_v52, %v2595_v53 }
 0x21a   : > { %v1170_v54 = vpop.xlane.xlu1 %1169 }
 0x21b   : > { %v1202_v58 = vrot.slane %v1170_v54, %v2595_v53 }
 0x21c   : > { %v1168_v55 = vpop.xlane.xlu0 %1167 }
 0x21d   : > { %v1198_v57 = vrot.slane %v1168_v55, %v2595_v53 }
 0x21e   : > { %v1172_v59 = vpop.xlane.xlu1 %1171 }
 0x21f   : > { %v1224_v60 = vsel %vm1223_vm1, %v1198_v57, %v1194_v56  ;;  %v1206_v22 = vrot.slane %v1172_v59, %v2595_v53 }
 0x220   : > { %v1226_v61 = vsel %vm1225_vm2, %v1202_v58, %v1224_v60  ;;  %v1174_v62 = vpop.xlane.xlu0 %1173 }
 0x221   : > { %v1228_v63 = vsel %vm1227_vm3, %v1206_v22, %v1226_v61  ;;  %v1210_v0 = vrot.slane %v1174_v62, %v2595_v53 }
 0x222   : > { %v1176_v1 = vpop.xlane.xlu1 %1175 }
 0x223   : > { %v1230_v2 = vsel %vm1229_vm4, %v1210_v0, %v1228_v63  ;;  %v1214_v3 = vrot.slane %v1176_v1, %v2595_v53 }
 0x224   : > { %v1178_v4 = vpop.xlane.xlu0 %1177 }
 0x225   : > { %v1218_v5 = vrot.slane %v1178_v4, %v2595_v53  ;;  %v1232_v6 = vsel %vm1231_vm5, %v1214_v3, %v1230_v2 }
 0x226   : > { %v1180_v7 = vpop.xlane.xlu1 %1179 }
 0x227   : > { %v1222_v8 = vrot.slane %v1180_v7, %v2595_v53  ;;  %v1234_v9 = vsel %vm1233_vm6, %v1218_v5, %v1232_v6 }
 0x229   : > { %v1236_v11 = vsel %vm1235_vm7, %v1222_v8, %v1234_v9 }
 0x22a   : > { %v1239_v10 = vsel %vm1238_vm8, %v1236_v11, -inf }
 0x22b   : > { %1240 = vmax.xlane.f32.xlu0 %v1239_v10 }
 0x2b8   : > { %v1241_v13 = vpop.xlane.xlu0 %1240 }
 0x2b9   : > { %v1246_v14 = vrot.slane %v1241_v13, %v2550_v24  ;;  %v1250_v15 = vrot.slane %v1241_v13, %v2559_v30  ;;  %v1254_v16 = vrot.slane %v1241_v13, %v2566_v48  ;;  %v1258_v18 = vrot.slane %v1241_v13, %v1257_v12 }
 0x2ba   : > { %v1262_v28 = vrot.slane %v1241_v13, %v1261_v17  ;;  %v1266_v33 = vrot.slane %v1241_v13, %v1265_v27  ;;  %v1270_v37 = vrot.slane %v1241_v13, %v1269_v32  ;;  %v1274_v42 = vrot.slane %v1241_v13, %v1273_v36 }
 0x2bb   : > { %v1283_v19 = vsub.f32 %v1166_v52, %v1246_v14  ;;  %v1284_v20 = vsub.f32 %v1168_v55, %v1250_v15  ;;  %v1285_v21 = vsub.f32 %v1170_v54, %v1254_v16  ;;  %v1286_v29 = vsub.f32 %v1172_v59, %v1258_v18 }
 0x2bc   : > { %v1287_v34 = vsub.f32 %v1174_v62, %v1262_v28  ;;  %v1288_v38 = vsub.f32 %v1176_v1, %v1266_v33  ;;  %v1289_v43 = vsub.f32 %v1178_v4, %v1270_v37  ;;  %v1290_v46 = vsub.f32 %v1180_v7, %v1274_v42 }
 0x2bd   : > { %v1291_v25 = vmul.f32 1.442695, %v1283_v19  ;;  %v1293_v26 = vmul.f32 1.442695, %v1284_v20  ;;  %v1295_v31 = vmul.f32 1.442695, %v1285_v21 }
 0x2be   : > { %v1297_v35 = vmul.f32 1.442695, %v1286_v29  ;;  %v1299_v39 = vmul.f32 1.442695, %v1287_v34  ;;  %v1301_v44 = vmul.f32 1.442695, %v1288_v38 }
 0x2bf   : > { %2114 = vpow2.f32 %v1291_v25  ;;  %v1303_v47 = vmul.f32 1.442695, %v1289_v43  ;;  %v1305_v50 = vmul.f32 1.442695, %v1290_v46 }
 0x2c0   : > { %2116 = vpow2.f32 %v1293_v26 }
 0x2c1   : > { %2118 = vpow2.f32 %v1295_v31 }
 0x2c2   : > { %2120 = vpow2.f32 %v1297_v35 }
 0x2c3   : > { %2122 = vpow2.f32 %v1299_v39 }
 0x2c4   : > { %2124 = vpow2.f32 %v1301_v44 }
 0x2c5   : > { %2126 = vpow2.f32 %v1303_v47 }
 0x2c6   : > { %2128 = vpow2.f32 %v1305_v50 }
 0x2c9   : > { %v2115_v40 = vpop.eup %2114 }
 0x2ca   : > { %v2117_v41 = vpop.eup %2116  ;;  %1316 = vperm.xlu1 %2006, %v2115_v40  }
 0x2cb   : > { %1319 = vperm.xlu0 %2007, %v2117_v41   ;;  %v2119_v45 = vpop.eup %2118 }
 0x2cc   : > { %v2121_v49 = vpop.eup %2120 }
 0x2cd   : > { %v2123_v51 = vpop.eup %2122 }
 0x2ce   : > { %1322 = vperm.xlu1 %2006, %v2119_v45   ;;  %v2125_v52 = vpop.eup %2124 }
 0x2cf   : > { %v2127_v54 = vpop.eup %2126 }
 0x2d0   : > { %v2129_v55 = vpop.eup %2128 }
 0x2d2   : > { %1325 = vperm.xlu1 %2006, %v2121_v49  }
 0x2d6   : > { %1328 = vperm.xlu1 %2006, %v2123_v51  }
 0x2da   : > { %1331 = vperm.xlu1 %2006, %v2125_v52  }
 0x2de   : > { %1334 = vperm.xlu1 %2006, %v2127_v54  }
 0x2e2   : > { %1337 = vperm.xlu1 %2006, %v2129_v55  }
 0x349   : > { %v1317_v56 = vpop.permute.xlu1 %1316 }
 0x34a   : > { %v1320_v60 = vpop.permute.xlu0 %1319  ;;  %v1342_v62 = vrot.slane %v1317_v56, %v2595_v53 }
 0x34b   : > { %v1346_v61 = vrot.slane %v1320_v60, %v2595_v53 }
 0x34d   : > { %v1323_v57 = vpop.permute.xlu1 %1322  ;;  %v1371_v3 = vsel %vm1223_vm1, %v1346_v61, %v1342_v62  ;;  %v1902_v62 = vld [vmem:[%s2756_s1 + $0x18] sm:$0xff]  }
 0x34e   : > { %v1350_v63 = vrot.slane %v1323_v57, %v2595_v53 }
 0x350   : > { %v1372_v5 = vsel %vm1225_vm2, %v1350_v63, %v1371_v3 }
 0x351   : > { %v1326_v58 = vpop.permute.xlu1 %1325 }
 0x352   : > { %v1354_v0 = vrot.slane %v1326_v58, %v2595_v53 }
 0x354   : > { %v1373_v7 = vsel %vm1227_vm3, %v1354_v0, %v1372_v5 }
 0x355   : > { %v1329_v59 = vpop.permute.xlu1 %1328 }
 0x356   : > { %v1358_v1 = vrot.slane %v1329_v59, %v2595_v53 }
 0x358   : > { %v1374_v8 = vsel %vm1229_vm4, %v1358_v1, %v1373_v7 }
 0x359   : > { %v1332_v22 = vpop.permute.xlu1 %1331 }
 0x35a   : > { %v1362_v4 = vrot.slane %v1332_v22, %v2595_v53 }
 0x35c   : > { %v1375_v11 = vsel %vm1231_vm5, %v1362_v4, %v1374_v8 }
 0x35d   : > { %v1335_v2 = vpop.permute.xlu1 %1334 }
 0x35e   : > { %v1366_v6 = vrot.slane %v1335_v2, %v2595_v53 }
 0x360   : > { %v1376_v13 = vsel %vm1233_vm6, %v1366_v6, %v1375_v11  ;;  %v1895_v6 = vunpack.c.l.bf16 %v1902_v62 }
 0x361   : > { %v1338_v9 = vpop.permute.xlu1 %1337 }
 0x362   : > { %v1370_v10 = vrot.slane %v1338_v9, %v2595_v53 }
 0x364   : > { %v1377_v14 = vsel %vm1235_vm7, %v1370_v10, %v1376_v13 }
 0x365   : > { %v1379_v15 = vsel %vm1238_vm8, %v1377_v14, 0.0 }
 0x366   : > { %1380 = vadd.xlane.f32.xlu1 %v1379_v15 }
 0x3f3   : > { %v1381_v16 = vpop.xlane.xlu1 %1380 }
 0x3f4   : > { %2130 = vrcp.f32 %v1381_v16 }
 0x3fe   : > { %v2131_v18 = vpop.eup %2130 }
 0x3ff   : > { %v1387_v19 = vrot.slane %v2131_v18, %v2550_v24  ;;  %v1391_v21 = vrot.slane %v2131_v18, %v2559_v30  ;;  %v1395_v26 = vrot.slane %v2131_v18, %v2566_v48  ;;  %v1399_v29 = vrot.slane %v2131_v18, %v1257_v12 }
 0x400   : > { %v1403_v33 = vrot.slane %v2131_v18, %v1261_v17  ;;  %v1407_v24 = vrot.slane %v2131_v18, %v1265_v27  ;;  %v1411_v48 = vrot.slane %v2131_v18, %v1269_v32  ;;  %v1415_v12 = vrot.slane %v2131_v18, %v1273_v36  ;;  %v1882_v17 = vld [vmem:[%s2756_s1] sm:$0xff]  }
 0x401   : > { %v1424_v20 = vmul.f32 %v2115_v40, %v1387_v19  ;;  %v1425_v25 = vmul.f32 %v2117_v41, %v1391_v21  ;;  %v1426_v28 = vmul.f32 %v2119_v45, %v1395_v26  ;;  %v1427_v31 = vmul.f32 %v2121_v49, %v1399_v29  ;;  %v1900_v40 = vld [vmem:[%s2756_s1 + $0x8] sm:$0xff]   ;;  %v1901_v49 = vld [vmem:[%s2756_s1 + $0x10] sm:$0xff]  }
 0x402   : > { %v1428_v34 = vmul.f32 %v2123_v51, %v1403_v33  ;;  %v1429_v30 = vmul.f32 %v2125_v52, %v1407_v24  ;;  %v1430_v35 = vmul.f32 %v2127_v54, %v1411_v48  ;;  %v1431_v37 = vmul.f32 %v2129_v55, %v1415_v12 }
 0x403   : > { %1450 = vperm.xlu0 %2007, %v1424_v20   ;;  %v1883_v39 = vunpack.c.l.bf16 %v1882_v17  ;;  %v1884_v27 = vunpack.c.h.bf16 %v1882_v17  ;;  %v1887_v43 = vunpack.c.l.bf16 %v1900_v40  ;;  %v1888_v46 = vunpack.c.h.bf16 %v1900_v40 }
 0x404   : > { %v1891_v56 = vunpack.c.l.bf16 %v1901_v49  ;;  %v1892_v61 = vunpack.c.h.bf16 %v1901_v49  ;;  %v1896_v18 = vunpack.c.h.bf16 %v1902_v62 }
 0x407   : > { %1455 = vperm.xlu0 %2007, %v1425_v25  }
 0x40b   : > { %1460 = vperm.xlu0 %2007, %v1426_v28  }
 0x40f   : > { %1465 = vperm.xlu0 %2007, %v1427_v31  }
 0x413   : > { %1470 = vperm.xlu0 %2007, %v1428_v34  }
 0x417   : > { %1475 = vperm.xlu0 %2007, %v1429_v30  }
 0x41b   : > { %1480 = vperm.xlu0 %2007, %v1430_v35  }
 0x41f   : > { %1485 = vperm.xlu0 %2007, %v1431_v37  }
 0x482   : > { %v1451_v38 = vpop.permute.xlu0 %1450 }
 0x483   : > { %v1488_v41 = vmul.f32 %v1883_v39, %v1451_v38  ;;  %v1617_v8 = vrot.slane %v1451_v38, %v2595_v53 }
 0x485   : > { %v1496_v44 = vrot.slane %v1488_v41, 4 }
 0x486   : > { %v1456_v32 = vpop.permute.xlu0 %1455 }
 0x487   : > { %v1489_v42 = vmul.f32 %v1884_v27, %v1456_v32  ;;  %v1497_v52 = vadd.f32 %v1496_v44, %v1488_v41  ;;  %v1621_v1 = vrot.slane %v1456_v32, %v2595_v53 }
 0x489   : > { %v1502_v23 = vrot.slane %v1489_v42, 4  ;;  %v1498_v60 = vrot.slane %v1497_v52, 2  ;;  %v1646_v14 = vsel %vm1223_vm1, %v1621_v1, %v1617_v8 }
 0x48a   : > { %v1461_v36 = vpop.permute.xlu0 %1460 }
 0x48b   : > { %v1490_v45 = vmul.f32 %v1887_v43, %v1461_v36  ;;  %v1503_v50 = vadd.f32 %v1502_v23, %v1489_v42  ;;  %v1499_v7 = vadd.f32 %v1498_v60, %v1497_v52  ;;  %v1625_v9 = vrot.slane %v1461_v36, %v2595_v53 }
 0x48d   : > { %v1508_v47 = vrot.slane %v1490_v45, 4  ;;  %v1504_v58 = vrot.slane %v1503_v50, 2  ;;  %v1500_v28 = vrot.slane %v1499_v7, 1  ;;  %v1647_v29 = vsel %vm1225_vm2, %v1625_v9, %v1646_v14 }
 0x48e   : > { %v1466_v51 = vpop.permute.xlu0 %1465 }
 0x48f   : > { %v1491_v54 = vmul.f32 %v1888_v46, %v1466_v51  ;;  %v1509_v55 = vadd.f32 %v1508_v47, %v1490_v45  ;;  %v1505_v3 = vadd.f32 %v1504_v58, %v1503_v50  ;;  %v1629_v16 = vrot.slane %v1466_v51, %v2595_v53 }
 0x490   : > { %v1501_v23 = vadd.f32 %v1500_v28, %v1499_v7 }
 0x491   : > { %v1514_v57 = vrot.slane %v1491_v54, 4  ;;  %v1510_v63 = vrot.slane %v1509_v55, 2  ;;  %v1506_v19 = vrot.slane %v1505_v3, 1  ;;  %v1648_v12 = vsel %vm1227_vm3, %v1629_v16, %v1647_v29 }
 0x492   : > { %v1471_v59 = vpop.permute.xlu0 %1470 }
 0x493   : > { %v1515_v22 = vadd.f32 %v1514_v57, %v1491_v54  ;;  %v1492_v0 = vmul.f32 %v1891_v56, %v1471_v59  ;;  %v1511_v10 = vadd.f32 %v1510_v63, %v1509_v55  ;;  %v1633_v21 = vrot.slane %v1471_v59, %v2595_v53 }
 0x494   : > { %v1507_v17 = vadd.f32 %v1506_v19, %v1505_v3 }
 0x495   : > { %v1516_v2 = vrot.slane %v1515_v22, 2  ;;  %v1520_v4 = vrot.slane %v1492_v0, 4  ;;  %v1512_v34 = vrot.slane %v1511_v10, 1  ;;  %v1649_v39 = vsel %vm1229_vm4, %v1633_v21, %v1648_v12 }
 0x496   : > { %v1476_v5 = vpop.permute.xlu0 %1475  ;;  %v1858_v52 = vpack.c.bf16 %v1507_v17, %v1507_v17 }
 0x497   : > { %v1493_v11 = vmul.f32 %v1892_v61, %v1476_v5  ;;  %v1521_v13 = vadd.f32 %v1520_v4, %v1492_v0  ;;  %v1517_v15 = vadd.f32 %v1516_v2, %v1515_v22  ;;  %v1637_v31 = vrot.slane %v1476_v5, %v2595_v53 }
 0x498   : > { %v1513_v36 = vadd.f32 %v1512_v34, %v1511_v10 }
 0x499   : > { %v1522_v20 = vrot.slane %v1521_v13, 2  ;;  %v1526_v25 = vrot.slane %v1493_v11, 4  ;;  %v1518_v35 = vrot.slane %v1517_v15, 1  ;;  %v1650_v32 = vsel %vm1231_vm5, %v1637_v31, %v1649_v39 }
 0x49a   : > { %v1481_v26 = vpop.permute.xlu0 %1480 }
 0x49b   : > { %v1494_v33 = vmul.f32 %v1895_v6, %v1481_v26  ;;  %v1523_v24 = vadd.f32 %v1522_v20, %v1521_v13  ;;  %v1527_v30 = vadd.f32 %v1526_v25, %v1493_v11  ;;  %v1641_v48 = vrot.slane %v1481_v26, %v2595_v53 }
 0x49c   : > { %v1519_v46 = vadd.f32 %v1518_v35, %v1517_v15 }
 0x49d   : > { %v1532_v37 = vrot.slane %v1494_v33, 4  ;;  %v1524_v38 = vrot.slane %v1523_v24, 1  ;;  %v1528_v27 = vrot.slane %v1527_v30, 2  ;;  %v1651_v45 = vsel %vm1233_vm6, %v1641_v48, %v1650_v32 }
 0x49e   : > { %v1486_v40 = vpop.permute.xlu0 %1485 }
 0x49f   : > { %v1533_v41 = vadd.f32 %v1532_v37, %v1494_v33  ;;  %v1495_v42 = vmul.f32 %v1896_v18, %v1486_v40  ;;  %v1645_v43 = vrot.slane %v1486_v40, %v2595_v53  ;;  %v1529_v44 = vadd.f32 %v1528_v27, %v1527_v30 }
 0x4a0   : > { %v1525_v50 = vadd.f32 %v1524_v38, %v1523_v24 }
 0x4a1   : > { %v1534_v47 = vrot.slane %v1533_v41, 2  ;;  %v1538_v49 = vrot.slane %v1495_v42, 4  ;;  %v1652_v53 = vsel %vm1235_vm7, %v1645_v43, %v1651_v45  ;;  %v1530_v51 = vrot.slane %v1529_v44, 1 }
 0x4a2   : > { %1654 = vst.msk [vmem:[%s2770_s17] sm:$0xff] %vm1238_vm8, %v1652_v53 }
 0x4a3   : > { %v1535_v54 = vadd.f32 %v1534_v47, %v1533_v41  ;;  %v1539_v55 = vadd.f32 %v1538_v49, %v1495_v42 }
 0x4a4   : > { %2145 = shalt.err (!%p2142_p4)
}
 0x4a5   : > { %s2146_s22 = scalar_lea.hbm %s2692_s26, 128  ;;  %s2150_s24 = scalar_lea.hbm %s2764_s9, 1024 }
 0x4a6   : > { %p2147_p7 = scmp.ne.s32.totalorder %s2692_s26, %s2146_s22  ;;  %p2151_p10 = scmp.lt.u32.totalorder %s2692_s26, %s2764_s9 }
 0x4a7   : > { %p2152_p11 = scmp.lt.u32.totalorder %s2150_s24, %s2146_s22  ;;  %p2154_p13 = scmp.lt.u32.totalorder %s2146_s22, %s2692_s26 }
 0x4a8   : > { %p2148_p8 = pnand %p2147_p7, %p2290_p5 }
 0x4a9   : > { %p2153_p12 = por %p2152_p11, %p2151_p10 }
 0x4aa   : > { %p2149_p9 = pneg %p2148_p8 }
 0x4ab   : > { %p2155_p0 = por %p2154_p13, %p2153_p12 }
 0x4ad   : > { %p2156_p1 = pnand %p2155_p0, %p2149_p9 }
 0x4af   : > { %2159 = shalt.err (!%p2156_p1)
}
 0x4b0   : > { %1962 = dma.vmem_to_hbm [thread:$0]  (%p2290_p5), %s2694_s23, 128, %s2692_s26, %s1661_s18   ;;  %v1857_v56 = vpack.c.bf16 %v1501_v23, %v1501_v23  ;;  %v1859_v57 = vpack.c.bf16 %v1513_v36, %v1513_v36  ;;  %v1531_v58 = vadd.f32 %v1530_v51, %v1529_v44  ;;  %v1860_v59 = vpack.c.bf16 %v1519_v46, %v1519_v46 }
 0x4b1   : > { %v1536_v60 = vrot.slane %v1535_v54, 1  ;;  %v1540_v22 = vrot.slane %v1539_v55, 2  ;;  %v1553_v61 = vsel %vm1223_vm1, %v1507_v17, %v1501_v23  ;;  %v1861_v62 = vpack.c.bf16 %v1525_v50, %v1525_v50 }
 0x4b2   : > { %v1597_v63 = vunpack.c.l.b16 %v1858_v52  ;;  %v1862_v0 = vpack.c.bf16 %v1531_v58, %v1531_v58  ;;  %v1596_v3 = vunpack.c.l.b16 %v1857_v56  ;;  %v1554_v4 = vsel %vm1225_vm2, %v1513_v36, %v1553_v61 }
 0x4b3   : > { %v1537_v1 = vadd.f32 %v1536_v60, %v1535_v54  ;;  %v1541_v2 = vadd.f32 %v1540_v22, %v1539_v55  ;;  %v1598_v5 = vunpack.c.l.b16 %v1859_v57  ;;  %v1555_v6 = vsel %vm1227_vm3, %v1519_v46, %v1554_v4 }
 0x4b4   : > { %v1599_v7 = vunpack.c.l.b16 %v1860_v59  ;;  %v1556_v11 = vsel %vm1229_vm4, %v1525_v50, %v1555_v6  ;;  %v1600_v10 = vunpack.c.l.b16 %v1861_v62  ;;  %v1604_v13 = vsel %vm1223_vm1, %v1597_v63, %v1596_v3 }
 0x4b5   : > { %v1863_v8 = vpack.c.bf16 %v1537_v1, %v1537_v1  ;;  %v1542_v9 = vrot.slane %v1541_v2, 1  ;;  %v1557_v14 = vsel %vm1231_vm5, %v1531_v58, %v1556_v11  ;;  %v1601_v15 = vunpack.c.l.b16 %v1862_v0 }
 0x4b6   : > { %v1605_v18 = vsel %vm1225_vm2, %v1598_v5, %v1604_v13  ;;  %v1558_v19 = vsel %vm1233_vm6, %v1537_v1, %v1557_v14 }
 0x4b7   : > { %v1543_v16 = vadd.f32 %v1542_v9, %v1541_v2  ;;  %v1602_v20 = vunpack.c.l.b16 %v1863_v8  ;;  %v1606_v21 = vsel %vm1227_vm3, %v1599_v7, %v1605_v18 }
 0x4b8   : > { %v1607_v28 = vsel %vm1229_vm4, %v1600_v10, %v1606_v21 }
 0x4b9   : > { %v1559_v25 = vsel %vm1235_vm7, %v1543_v16, %v1558_v19  ;;  %v1864_v26 = vpack.c.bf16 %v1543_v16, %v1543_v16  ;;  %v1608_v29 = vsel %vm1231_vm5, %v1601_v15, %v1607_v28 }
 0x4ba   : > { %1561 = vst [vmem:[#allocation3] sm:$0xff] %v1559_v25  ;;  %v1609_v33 = vsel %vm1233_vm6, %v1602_v20, %v1608_v29 }
 0x4bb   : > { %v1603_v31 = vunpack.c.l.b16 %v1864_v26 }
 0x4bd   : > { %v1610_v34 = vsel %vm1235_vm7, %v1603_v31, %v1609_v33 }
 0x4be   : > { %v1611_v24 = vpack.c.b16 %v1610_v34, %v1610_v34 }
 0x4c0   : > { %1613 = vst [vmem:[%s2315_s16 + $0x4] sm:$0xf] %v1611_v24 }
 0x4c1 PF: > { %p1968_p5 = scmp.ge.s32.totalorder %s2194_s12, 2  ;;  %s1697_s19 = sand.u32 1, %s2182_s30  }
 0x4c2   : > { %s1698_s23 = scalar_lea.sflag [#allocation5], %s1697_s19 }
 0x4c3   : > { %p1965_p2 = pnand %p1968_p5, %p2294_p6 }
 0x4c5   : > { %2177 = dma.done.wait (!%p1965_p2), %s1698_s23, 128  }
 0x4c6   : > { %2179 = vsyncadd (!%p1965_p2), %s1698_s23, 4294967168  ;;  %s2772_s26 = sld [smem:[#allocation7_spill]]  ;;  %p20_p3 = scmp.ge.s32.totalorder %s2277_s15, 10  }
 0x4c7   : > { %s2773_s30 = smov %s2186_s10  ;;  %s2774_s10 = smov %s2190_s11 }
 0x4c8   : > { %s2776_s12 = smov %s2277_s15  ;;  %22 = sbr.rel (!%p20_p3) target bundleno = 3 (0x3), region = 103 }
 0x4cc   : > { %s2775_s11 = smov %s2772_s26 }
 0x4cf   :  { %1703 = vsyncpa [#allocation5], 1 }
 0x4d0   :  { %1705 = vsyncpa [#allocation5 + $0x1], 1 }

</bundles_post_ra>
